<compile_context>
chip_gen: v7x
topology: tpu7x:2x2x1
jax: 0.10.0
libtpu: 0.0.40
codegen_flags: <defaults>
</compile_context>

<pallas_src>
import jax
import jax.numpy as jnp
import numpy as np
from jax.experimental import pallas as pl
from jax.experimental.pallas import tpu as pltpu

VMEM = pl.BlockSpec(memory_space=pltpu.MemorySpace.VMEM)
ANY = pl.BlockSpec(memory_space=pl.ANY)


def _round16(n):
    return ((n + 15) // 16) * 16


def _layout(cin, num_classes):
    """Row offsets of each logical block inside the two flat bf16 weight buffers.

    Every block starts at a multiple of 16 rows so bf16 (16,128)-tiled slices
    inside the kernel are tile-aligned.
    """
    r1_rows = cin * 28                       # conv1 banded-weight rows (ci*28 + w_in)
    r1_blk = _round16(r1_rows)
    a_se = 5 * r1_blk                        # pool1 [even|odd] selector block
    a_rows = a_se + _round16(168)
    b_r2_blk = _round16(84)                  # conv2 banded-weight block stride
    b_se = 5 * b_r2_blk                      # pool2 [even|odd] selector block
    b_fc1 = b_se + _round16(160)
    b_fc2 = b_fc1 + _round16(400)
    b_fc3 = b_fc2 + _round16(120)
    b_rows = b_fc3 + _round16(84)
    return dict(r1_rows=r1_rows, r1_blk=r1_blk, a_se=a_se, a_rows=a_rows,
                b_r2_blk=b_r2_blk, b_se=b_se, b_fc1=b_fc1, b_fc2=b_fc2,
                b_fc3=b_fc3, b_rows=b_rows)


# ------------------------------ fused kernel -------------------------------

def _make_kernel(cin, num_classes, L):
    bf16, f32 = jnp.bfloat16, jnp.float32
    nc = num_classes

    def kernel(x_ref, b_ref, wa_ref, wb_hbm, out_ref,
               x1_s, zc1_s, zc2_s, p2f_s, wb_s, dma_sem):
        # Kick off the conv2/classifier weight DMA immediately so it overlaps
        # the conv1 + pool1 compute (buffer B is not needed until conv2).
        wb_cp = pltpu.make_async_copy(wb_hbm, wb_s, dma_sem)
        wb_cp.start()

        def mm(a, b):
            return jnp.dot(a, b, preferred_element_type=f32)

        # --- build the conv1 LHS in VMEM: rows = h+2 (h zero-pad), cols = ci*28+w.
        #     (raw NCHW in; the w-pad is folded into r1's clipped bands, so there
        #      is no wrapper-side transpose/pad/reshape at all.)
        x1_s[...] = jnp.zeros_like(x1_s)
        for ci in range(cin):
            x1_s[pl.ds(2, 28), pl.ds(ci * 28, 28)] = x_ref[0, ci]

        # --- conv1 (5x5, pad 2) + bias + ReLU: 5 row-shifted banded matmuls.
        acc1 = mm(x1_s[pl.ds(0, 28), :].astype(bf16),
                  wa_ref[pl.ds(0, L["r1_rows"]), :])
        for kh in range(1, 5):
            acc1 += mm(x1_s[pl.ds(kh, 28), :].astype(bf16),
                       wa_ref[pl.ds(kh * L["r1_blk"], L["r1_rows"]), :])
        y1 = jnp.maximum(acc1 + b_ref[0:1, :], 0.0).astype(bf16)           # (28,168)

        # --- pool1: w-pairs via ONE 0/1 selection matmul ([even|odd] packed),
        #     h-pairs via strided sublane reads + VPU max (no MXU op).
        zcat1 = mm(y1, wa_ref[pl.ds(L["a_se"], 168), :])                   # (28,168)
        zc1_s[...] = jnp.maximum(zcat1[:, 0:84], zcat1[:, 84:168])         # (28, 84)
        p1 = jnp.maximum(zc1_s[pl.ds(0, 14, stride=2), :],
                         zc1_s[pl.ds(1, 14, stride=2), :])                 # (14, 84)

        # conv2/classifier weights are needed from here on.
        wb_cp.wait()

        # --- conv2 (5x5, valid) + bias + ReLU.
        acc2 = mm(p1[0:10, :].astype(bf16), wb_s[pl.ds(0, 84), :])
        for kh in range(1, 5):
            acc2 += mm(p1[kh:kh + 10, :].astype(bf16),
                       wb_s[pl.ds(kh * L["b_r2_blk"], 84), :])
        y2 = jnp.maximum(acc2 + b_ref[1:2, 0:160], 0.0).astype(bf16)       # (10,160)

        # --- pool2 (same scheme).
        zcat2 = mm(y2, wb_s[pl.ds(L["b_se"], 160), :])                     # (10,160)
        zc2_s[...] = jnp.maximum(zcat2[:, 0:80], zcat2[:, 80:160])         # (10, 80)
        p2 = jnp.maximum(zc2_s[pl.ds(0, 5, stride=2), :],
                         zc2_s[pl.ds(1, 5, stride=2), :])                  # (5, 80)

        # --- lane-major flatten into (1,400); torch (C,H,W) order lives in wfc1.
        for hp in range(5):
            p2f_s[:, pl.ds(hp * 80, 80)] = p2[hp:hp + 1, :]

        # --- classifier: fc1 is now a single (1,400)x(400,120) matmul.
        h = mm(p2f_s[...].astype(bf16),
               wb_s[pl.ds(L["b_fc1"], 400), pl.ds(0, 120)])
        h = jnp.maximum(h + b_ref[2:3, 0:120], 0.0).astype(bf16)           # (1,120)
        h = mm(h, wb_s[pl.ds(L["b_fc2"], 120), pl.ds(0, 84)])
        h = jnp.maximum(h + b_ref[3:4, 0:84], 0.0).astype(bf16)            # (1, 84)
        out = mm(h, wb_s[pl.ds(L["b_fc3"], 84), pl.ds(0, nc)])
        out_ref[...] = (out + b_ref[4:5, 0:nc]).astype(out_ref.dtype)

    return kernel


# ------------------------------ host wrapper --------------------------------

def cnn_forward_pallas(x_nchw, packed, *, num_classes):
    """x_nchw: (1, Cin, 28, 28) float32. packed: (bias_f32, bufA_bf16, bufB_bf16)."""
    n, cin, hh, ww = x_nchw.shape
    assert (n, hh, ww) == (1, 28, 28), "classifier needs 16*5*5=400 features => N=1, 28x28"
    bias, buf_a, buf_b = packed
    L = _layout(cin, num_classes)
    assert bias.shape == (5, 168)
    assert buf_a.shape == (L["a_rows"], 168)
    assert buf_b.shape == (L["b_rows"], 160)

    out = pl.pallas_call(
        _make_kernel(cin, num_classes, L),
        out_shape=jax.ShapeDtypeStruct((1, num_classes), jnp.float32),
        # x, biases, buffer A are auto-DMA'd to VMEM; buffer B stays in HBM and
        # is fetched by the in-kernel async copy (overlapped with conv1).
        in_specs=[VMEM, VMEM, VMEM, ANY],
        out_specs=VMEM,
        scratch_shapes=[
            pltpu.VMEM((32, cin * 28), jnp.float32),        # x1_s: padded conv1 LHS
            pltpu.VMEM((28, 84), jnp.float32),              # zc1_s: w-pooled conv1 map
            pltpu.VMEM((10, 80), jnp.float32),              # zc2_s: w-pooled conv2 map
            pltpu.VMEM((1, 400), jnp.float32),              # p2f_s: flattened features
            pltpu.VMEM((L["b_rows"], 160), jnp.bfloat16),   # wb_s: conv2+fc weights
            pltpu.SemaphoreType.DMA(()),                    # dma_sem
        ],
    )(x_nchw.astype(jnp.float32), bias, buf_a, buf_b)
    return out[0]


# ------------------------------- parameters ---------------------------------

def _uniform(key, shape, fan_in):
    bound = 1.0 / float(np.sqrt(fan_in))
    return jax.random.uniform(key, shape, jnp.float32, -bound, bound)


def init_params(key, input_channels, num_classes):
    """PyTorch-layout weights (Conv2d: (Cout, Cin, kh, kw); Linear: (out, in))."""
    ks = jax.random.split(key, 10)
    p = {}
    p["conv1_w"] = _uniform(ks[0], (6, input_channels, 5, 5), input_channels * 25)
    p["conv1_b"] = _uniform(ks[1], (6,), input_channels * 25)
    p["conv2_w"] = _uniform(ks[2], (16, 6, 5, 5), 6 * 25)
    p["conv2_b"] = _uniform(ks[3], (16,), 6 * 25)
    dims = [400, 120, 84, num_classes]
    for i, (din, dout) in enumerate(zip(dims[:-1], dims[1:])):
        p[f"fc{i + 1}_w"] = _uniform(ks[4 + 2 * i], (dout, din), din)
        p[f"fc{i + 1}_b"] = _uniform(ks[5 + 2 * i], (dout,), din)
    return p


def pack_params(p, input_channels, num_classes):
    """One-time host-side repack of torch-layout weights into the kernel layout."""
    cin = input_channels
    L = _layout(cin, num_classes)
    w1 = np.asarray(p["conv1_w"], np.float32)
    b1 = np.asarray(p["conv1_b"], np.float32)
    w2 = np.asarray(p["conv2_w"], np.float32)
    b2 = np.asarray(p["conv2_b"], np.float32)
    wf1 = np.asarray(p["fc1_w"], np.float32)
    bf1 = np.asarray(p["fc1_b"], np.float32)
    wf2 = np.asarray(p["fc2_w"], np.float32)
    bf2 = np.asarray(p["fc2_b"], np.float32)
    wf3 = np.asarray(p["fc3_w"], np.float32)
    bf3 = np.asarray(p["fc3_b"], np.float32)

    # conv1 banded weights with the w-padding folded in (clipped bands):
    # r1[kh, ci*28 + w_in, w*6 + co] = w1[co, ci, kh, w_in - w + 2]
    r1 = np.zeros((5, cin * 28, 28 * 6), np.float32)
    for kh in range(5):
        for kw in range(5):
            for w in range(28):
                w_in = w + kw - 2
                if 0 <= w_in < 28:
                    for ci in range(cin):
                        r1[kh, ci * 28 + w_in, w * 6:(w + 1) * 6] = w1[:, ci, kh, kw]

    # pool1 column (w-pair) 0/1 selection, packed [even | odd] side by side.
    se1 = np.zeros((28 * 6, 168), np.float32)
    for wp in range(14):
        for co in range(6):
            se1[(2 * wp) * 6 + co, wp * 6 + co] = 1.0
            se1[(2 * wp + 1) * 6 + co, 84 + wp * 6 + co] = 1.0

    # conv2 banded weights (valid): r2[kh, w_in*6 + ci, w*16 + co] = w2[co, ci, kh, w_in - w]
    r2 = np.zeros((5, 14 * 6, 10 * 16), np.float32)
    for kh in range(5):
        for kw in range(5):
            blk = w2[:, :, kh, kw].T                         # (6, 16)
            for w in range(10):
                w_in = w + kw
                r2[kh, w_in * 6:(w_in + 1) * 6, w * 16:(w + 1) * 16] = blk

    # pool2 column selection, packed [even | odd].
    se2 = np.zeros((10 * 16, 160), np.float32)
    for wp in range(5):
        for co in range(16):
            se2[(2 * wp) * 16 + co, wp * 16 + co] = 1.0
            se2[(2 * wp + 1) * 16 + co, 80 + wp * 16 + co] = 1.0

    # fc1 as ONE (400,120) matmul; torch's (C,H,W) flatten permutation folded in:
    # p2flat lane = hp*80 + wp*16 + co  <->  torch index co*25 + hp*5 + wp.
    wfc1 = np.zeros((400, 120), np.float32)
    for hp in range(5):
        for wp in range(5):
            for co in range(16):
                wfc1[hp * 80 + wp * 16 + co, :] = wf1[:, co * 25 + hp * 5 + wp]
    wfc2 = np.ascontiguousarray(wf2.T)                       # (120, 84)
    wfc3 = np.ascontiguousarray(wf3.T)                       # (84, num_classes)

    # biases: exact f32, one tiny (5, 168) buffer (row r = layer r, lane-padded).
    bias = np.zeros((5, 168), np.float32)
    bias[0, :168] = np.tile(b1, 28)
    bias[1, :160] = np.tile(b2, 10)
    bias[2, :120] = bf1
    bias[3, :84] = bf2
    bias[4, :num_classes] = bf3

    # flat bf16 buffer A (conv1 stage): r1 blocks then [se1c|so1c].
    buf_a = np.zeros((L["a_rows"], 168), np.float32)
    for kh in range(5):
        buf_a[kh * L["r1_blk"]:kh * L["r1_blk"] + cin * 28, :] = r1[kh]
    buf_a[L["a_se"]:L["a_se"] + 168, :] = se1

    # flat bf16 buffer B (conv2 + classifier stage): r2 blocks, [se2c|so2c], fc1..fc3.
    buf_b = np.zeros((L["b_rows"], 160), np.float32)
    for kh in range(5):
        buf_b[kh * L["b_r2_blk"]:kh * L["b_r2_blk"] + 84, :] = r2[kh]
    buf_b[L["b_se"]:L["b_se"] + 160, :] = se2
    buf_b[L["b_fc1"]:L["b_fc1"] + 400, :120] = wfc1
    buf_b[L["b_fc2"]:L["b_fc2"] + 120, :84] = wfc2
    buf_b[L["b_fc3"]:L["b_fc3"] + 84, :num_classes] = wfc3

    return (jnp.asarray(bias, jnp.float32),
            jnp.asarray(buf_a, jnp.bfloat16),
            jnp.asarray(buf_b, jnp.bfloat16))


# --------------------------- numpy reference (exact) ------------------------

def cnn_forward_ref_np(x_nchw, p):
    x = np.transpose(np.asarray(x_nchw[0], np.float64), (1, 2, 0))        # HWC

    def conv_valid(inp, w_t, b):
        H, W, C = inp.shape
        K = w_t.shape[2]
        Ho, Wo = H - K + 1, W - K + 1
        out = np.zeros((Ho, Wo, w_t.shape[0]), np.float64)
        for kh in range(K):
            for kw in range(K):
                out += inp[kh:kh + Ho, kw:kw + Wo, :] @ w_t[:, :, kh, kw].T.astype(np.float64)
        return out + np.asarray(b, np.float64)

    def pool2(y):
        H, W, C = y.shape
        return y.reshape(H // 2, 2, W // 2, 2, C).max(axis=(1, 3))

    xp = np.pad(x, ((2, 2), (2, 2), (0, 0)))
    y1 = np.maximum(conv_valid(xp, np.asarray(p["conv1_w"]), p["conv1_b"]), 0.0)
    p1 = pool2(y1)
    y2 = np.maximum(conv_valid(p1, np.asarray(p["conv2_w"]), p["conv2_b"]), 0.0)
    p2 = pool2(y2)
    flat = np.transpose(p2, (2, 0, 1)).reshape(-1)                        # torch flatten (C,H,W)
    h = np.maximum(flat @ np.asarray(p["fc1_w"], np.float64).T + np.asarray(p["fc1_b"], np.float64), 0.0)
    h = np.maximum(h @ np.asarray(p["fc2_w"], np.float64).T + np.asarray(p["fc2_b"], np.float64), 0.0)
    return h @ np.asarray(p["fc3_w"], np.float64).T + np.asarray(p["fc3_b"], np.float64)


# ----------------------------------- main ------------------------------------

if __name__ == "__main__":
    key = jax.random.PRNGKey(0)
    k_x, k_p = jax.random.split(key)
    input_channels, num_classes = 3, 10
    # batch=1, 28x28 spatial => 16*5*5 = 400 flattened features, as the module requires.
    x = jax.random.normal(k_x, (1, input_channels, 28, 28), jnp.float32)
    params = init_params(k_p, input_channels, num_classes)
    packed = pack_params(params, input_channels, num_classes)

    forward = jax.jit(cnn_forward_pallas, static_argnames=("num_classes",))
    y = jax.block_until_ready(forward(x, packed, num_classes=num_classes))
    assert y.shape == (num_classes,)

    y_ref = cnn_forward_ref_np(np.asarray(x), {k: np.asarray(v) for k, v in params.items()})
    # bf16 weight/activation storage with f32 accumulation => ~1e-3 worst-case logit error.
    np.testing.assert_allclose(np.asarray(y), y_ref, rtol=5e-3, atol=5e-3)

    print("KERNEL_OK")
</pallas_src>

<mosaic_0001>
module attributes {stable_mosaic.version = 11 : i64} {
  func.func @kernel(%arg0: memref<1x3x28x28xf32, #tpu.memory_space<vmem>>, %arg1: memref<5x168xf32, #tpu.memory_space<vmem>>, %arg2: memref<656x168xbf16, #tpu.memory_space<vmem>>, %arg3: memref<1264x160xbf16, #tpu.memory_space<any>>, %arg4: memref<1x10xf32, #tpu.memory_space<vmem>>, %arg5: memref<32x84xf32, #tpu.memory_space<vmem>>, %arg6: memref<28x84xf32, #tpu.memory_space<vmem>>, %arg7: memref<10x80xf32, #tpu.memory_space<vmem>>, %arg8: memref<1x400xf32, #tpu.memory_space<vmem>>, %arg9: memref<1264x160xbf16, #tpu.memory_space<vmem>>, %arg10: memref<!tpu.dma_semaphore, #tpu.memory_space<semaphore_mem>>) attributes {dimension_semantics = [], scalar_prefetch = 0 : i64, scratch_operands = 6 : i64, tpu.core_type = #tpu.core_type<tc>} {
    tpu.enqueue_dma source(%arg3 : memref<1264x160xbf16, #tpu.memory_space<any>>) target(%arg9 : memref<1264x160xbf16, #tpu.memory_space<vmem>>) target_semaphore(%arg10 : memref<!tpu.dma_semaphore, #tpu.memory_space<semaphore_mem>>)
    %cst = arith.constant 0.000000e+00 : f32
    %0 = vector.broadcast %cst : f32 to vector<32x84xf32>
    %c0 = arith.constant 0 : index
    %c0_0 = arith.constant 0 : index
    %1 = vector.load %arg5[%c0, %c0_0] : memref<32x84xf32, #tpu.memory_space<vmem>>, vector<32x84xf32>
    tpu.vector_store %arg5[%c0, %c0_0], %0 {strides = array<i32>} : memref<32x84xf32, #tpu.memory_space<vmem>>, vector<32x84xf32>,
    %c0_1 = arith.constant 0 : index
    %c0_2 = arith.constant 0 : index
    %c0_3 = arith.constant 0 : index
    %c0_4 = arith.constant 0 : index
    %2 = vector.load %arg0[%c0_1, %c0_2, %c0_3, %c0_4] : memref<1x3x28x28xf32, #tpu.memory_space<vmem>>, vector<1x1x28x28xf32>
    %3 = vector.shape_cast %2 : vector<1x1x28x28xf32> to vector<28x28xf32>
    %c2 = arith.constant 2 : index
    %c0_5 = arith.constant 0 : index
    %4 = vector.load %arg5[%c2, %c0_5] : memref<32x84xf32, #tpu.memory_space<vmem>>, vector<28x28xf32>
    tpu.vector_store %arg5[%c2, %c0_5], %3 {strides = array<i32>} : memref<32x84xf32, #tpu.memory_space<vmem>>, vector<28x28xf32>,
    %c0_6 = arith.constant 0 : index
    %c1 = arith.constant 1 : index
    %c0_7 = arith.constant 0 : index
    %c0_8 = arith.constant 0 : index
    %5 = vector.load %arg0[%c0_6, %c1, %c0_7, %c0_8] : memref<1x3x28x28xf32, #tpu.memory_space<vmem>>, vector<1x1x28x28xf32>
    %6 = vector.shape_cast %5 : vector<1x1x28x28xf32> to vector<28x28xf32>
    %c2_9 = arith.constant 2 : index
    %c28 = arith.constant 28 : index
    %7 = vector.load %arg5[%c2_9, %c28] : memref<32x84xf32, #tpu.memory_space<vmem>>, vector<28x28xf32>
    tpu.vector_store %arg5[%c2_9, %c28], %6 {strides = array<i32>} : memref<32x84xf32, #tpu.memory_space<vmem>>, vector<28x28xf32>,
    %c0_10 = arith.constant 0 : index
    %c2_11 = arith.constant 2 : index
    %c0_12 = arith.constant 0 : index
    %c0_13 = arith.constant 0 : index
    %8 = vector.load %arg0[%c0_10, %c2_11, %c0_12, %c0_13] : memref<1x3x28x28xf32, #tpu.memory_space<vmem>>, vector<1x1x28x28xf32>
    %9 = vector.shape_cast %8 : vector<1x1x28x28xf32> to vector<28x28xf32>
    %c2_14 = arith.constant 2 : index
    %c56 = arith.constant 56 : index
    %10 = vector.load %arg5[%c2_14, %c56] : memref<32x84xf32, #tpu.memory_space<vmem>>, vector<28x28xf32>
    tpu.vector_store %arg5[%c2_14, %c56], %9 {strides = array<i32>} : memref<32x84xf32, #tpu.memory_space<vmem>>, vector<28x28xf32>,
    %c0_15 = arith.constant 0 : index
    %c0_16 = arith.constant 0 : index
    %11 = vector.load %arg5[%c0_15, %c0_16] : memref<32x84xf32, #tpu.memory_space<vmem>>, vector<28x84xf32>
    %12 = arith.truncf %11 : vector<28x84xf32> to vector<28x84xbf16>
    %c0_17 = arith.constant 0 : index
    %c0_18 = arith.constant 0 : index
    %13 = vector.load %arg2[%c0_17, %c0_18] : memref<656x168xbf16, #tpu.memory_space<vmem>>, vector<84x168xbf16>
    %cst_19 = arith.constant dense<0.000000e+00> : vector<28x168xf32>
    %14 = tpu.matmul %12, %13, %cst_19 {dimension_numbers = #tpu.dot_dimension_numbers<[1], [0], [0], [1], [0, 0, 1, 1], [], []>} : vector<28x84xbf16>, vector<84x168xbf16>, vector<28x168xf32> -> vector<28x168xf32>
    %c1_20 = arith.constant 1 : index
    %c0_21 = arith.constant 0 : index
    %15 = vector.load %arg5[%c1_20, %c0_21] : memref<32x84xf32, #tpu.memory_space<vmem>>, vector<28x84xf32>
    %16 = arith.truncf %15 : vector<28x84xf32> to vector<28x84xbf16>
    %c96 = arith.constant 96 : index
    %c0_22 = arith.constant 0 : index
    %17 = vector.load %arg2[%c96, %c0_22] : memref<656x168xbf16, #tpu.memory_space<vmem>>, vector<84x168xbf16>
    %cst_23 = arith.constant dense<0.000000e+00> : vector<28x168xf32>
    %18 = tpu.matmul %16, %17, %cst_23 {dimension_numbers = #tpu.dot_dimension_numbers<[1], [0], [0], [1], [0, 0, 1, 1], [], []>} : vector<28x84xbf16>, vector<84x168xbf16>, vector<28x168xf32> -> vector<28x168xf32>
    %19 = arith.addf %14, %18 : vector<28x168xf32>
    %c2_24 = arith.constant 2 : index
    %c0_25 = arith.constant 0 : index
    %20 = vector.load %arg5[%c2_24, %c0_25] : memref<32x84xf32, #tpu.memory_space<vmem>>, vector<28x84xf32>
    %21 = arith.truncf %20 : vector<28x84xf32> to vector<28x84xbf16>
    %c192 = arith.constant 192 : index
    %c0_26 = arith.constant 0 : index
    %22 = vector.load %arg2[%c192, %c0_26] : memref<656x168xbf16, #tpu.memory_space<vmem>>, vector<84x168xbf16>
    %cst_27 = arith.constant dense<0.000000e+00> : vector<28x168xf32>
    %23 = tpu.matmul %21, %22, %cst_27 {dimension_numbers = #tpu.dot_dimension_numbers<[1], [0], [0], [1], [0, 0, 1, 1], [], []>} : vector<28x84xbf16>, vector<84x168xbf16>, vector<28x168xf32> -> vector<28x168xf32>
    %24 = arith.addf %19, %23 : vector<28x168xf32>
    %c3 = arith.constant 3 : index
    %c0_28 = arith.constant 0 : index
    %25 = vector.load %arg5[%c3, %c0_28] : memref<32x84xf32, #tpu.memory_space<vmem>>, vector<28x84xf32>
    %26 = arith.truncf %25 : vector<28x84xf32> to vector<28x84xbf16>
    %c288 = arith.constant 288 : index
    %c0_29 = arith.constant 0 : index
    %27 = vector.load %arg2[%c288, %c0_29] : memref<656x168xbf16, #tpu.memory_space<vmem>>, vector<84x168xbf16>
    %cst_30 = arith.constant dense<0.000000e+00> : vector<28x168xf32>
    %28 = tpu.matmul %26, %27, %cst_30 {dimension_numbers = #tpu.dot_dimension_numbers<[1], [0], [0], [1], [0, 0, 1, 1], [], []>} : vector<28x84xbf16>, vector<84x168xbf16>, vector<28x168xf32> -> vector<28x168xf32>
    %29 = arith.addf %24, %28 : vector<28x168xf32>
    %c4 = arith.constant 4 : index
    %c0_31 = arith.constant 0 : index
    %30 = vector.load %arg5[%c4, %c0_31] : memref<32x84xf32, #tpu.memory_space<vmem>>, vector<28x84xf32>
    %31 = arith.truncf %30 : vector<28x84xf32> to vector<28x84xbf16>
    %c384 = arith.constant 384 : index
    %c0_32 = arith.constant 0 : index
    %32 = vector.load %arg2[%c384, %c0_32] : memref<656x168xbf16, #tpu.memory_space<vmem>>, vector<84x168xbf16>
    %cst_33 = arith.constant dense<0.000000e+00> : vector<28x168xf32>
    %33 = tpu.matmul %31, %32, %cst_33 {dimension_numbers = #tpu.dot_dimension_numbers<[1], [0], [0], [1], [0, 0, 1, 1], [], []>} : vector<28x84xbf16>, vector<84x168xbf16>, vector<28x168xf32> -> vector<28x168xf32>
    %34 = arith.addf %29, %33 : vector<28x168xf32>
    %c0_34 = arith.constant 0 : index
    %c0_35 = arith.constant 0 : index
    %35 = vector.load %arg1[%c0_34, %c0_35] : memref<5x168xf32, #tpu.memory_space<vmem>>, vector<1x168xf32>
    %36 = vector.broadcast %35 : vector<1x168xf32> to vector<28x168xf32>
    %37 = arith.addf %34, %36 : vector<28x168xf32>
    %cst_36 = arith.constant 0.000000e+00 : f32
    %38 = vector.broadcast %cst_36 : f32 to vector<28x168xf32>
    %39 = arith.maximumf %37, %38 : vector<28x168xf32>
    %40 = arith.truncf %39 : vector<28x168xf32> to vector<28x168xbf16>
    %c480 = arith.constant 480 : index
    %c0_37 = arith.constant 0 : index
    %41 = vector.load %arg2[%c480, %c0_37] : memref<656x168xbf16, #tpu.memory_space<vmem>>, vector<168x168xbf16>
    %cst_38 = arith.constant dense<0.000000e+00> : vector<28x168xf32>
    %42 = tpu.matmul %40, %41, %cst_38 {dimension_numbers = #tpu.dot_dimension_numbers<[1], [0], [0], [1], [0, 0, 1, 1], [], []>} : vector<28x168xbf16>, vector<168x168xbf16>, vector<28x168xf32> -> vector<28x168xf32>
    %43 = vector.extract_strided_slice %42 {offsets = [0, 0], sizes = [28, 84], strides = [1, 1]} : vector<28x168xf32> to vector<28x84xf32>
    %44 = vector.extract_strided_slice %42 {offsets = [0, 84], sizes = [28, 84], strides = [1, 1]} : vector<28x168xf32> to vector<28x84xf32>
    %45 = arith.maximumf %43, %44 : vector<28x84xf32>
    %c0_39 = arith.constant 0 : index
    %c0_40 = arith.constant 0 : index
    %46 = vector.load %arg6[%c0_39, %c0_40] : memref<28x84xf32, #tpu.memory_space<vmem>>, vector<28x84xf32>
    tpu.vector_store %arg6[%c0_39, %c0_40], %45 {strides = array<i32>} : memref<28x84xf32, #tpu.memory_space<vmem>>, vector<28x84xf32>,
    %c0_41 = arith.constant 0 : index
    %c0_42 = arith.constant 0 : index
    %47 = tpu.strided_load %arg6[%c0_41, %c0_42] {strides = array<i32: 2, 1>} : memref<28x84xf32, #tpu.memory_space<vmem>>, vector<14x84xf32>
    %c1_43 = arith.constant 1 : index
    %c0_44 = arith.constant 0 : index
    %48 = tpu.strided_load %arg6[%c1_43, %c0_44] {strides = array<i32: 2, 1>} : memref<28x84xf32, #tpu.memory_space<vmem>>, vector<14x84xf32>
    %49 = arith.maximumf %47, %48 : vector<14x84xf32>
    tpu.wait_dma2 semaphore(%arg10 : memref<!tpu.dma_semaphore, #tpu.memory_space<semaphore_mem>>) src(%arg3 : memref<1264x160xbf16, #tpu.memory_space<any>>) dst(%arg9 : memref<1264x160xbf16, #tpu.memory_space<vmem>>)
    %50 = vector.extract_strided_slice %49 {offsets = [0, 0], sizes = [10, 84], strides = [1, 1]} : vector<14x84xf32> to vector<10x84xf32>
    %51 = arith.truncf %50 : vector<10x84xf32> to vector<10x84xbf16>
    %c0_45 = arith.constant 0 : index
    %c0_46 = arith.constant 0 : index
    %52 = vector.load %arg9[%c0_45, %c0_46] : memref<1264x160xbf16, #tpu.memory_space<vmem>>, vector<84x160xbf16>
    %cst_47 = arith.constant dense<0.000000e+00> : vector<10x160xf32>
    %53 = tpu.matmul %51, %52, %cst_47 {dimension_numbers = #tpu.dot_dimension_numbers<[1], [0], [0], [1], [0, 0, 1, 1], [], []>} : vector<10x84xbf16>, vector<84x160xbf16>, vector<10x160xf32> -> vector<10x160xf32>
    %54 = vector.extract_strided_slice %49 {offsets = [1, 0], sizes = [10, 84], strides = [1, 1]} : vector<14x84xf32> to vector<10x84xf32>
    %55 = arith.truncf %54 : vector<10x84xf32> to vector<10x84xbf16>
    %c96_48 = arith.constant 96 : index
    %c0_49 = arith.constant 0 : index
    %56 = vector.load %arg9[%c96_48, %c0_49] : memref<1264x160xbf16, #tpu.memory_space<vmem>>, vector<84x160xbf16>
    %cst_50 = arith.constant dense<0.000000e+00> : vector<10x160xf32>
    %57 = tpu.matmul %55, %56, %cst_50 {dimension_numbers = #tpu.dot_dimension_numbers<[1], [0], [0], [1], [0, 0, 1, 1], [], []>} : vector<10x84xbf16>, vector<84x160xbf16>, vector<10x160xf32> -> vector<10x160xf32>
    %58 = arith.addf %53, %57 : vector<10x160xf32>
    %59 = vector.extract_strided_slice %49 {offsets = [2, 0], sizes = [10, 84], strides = [1, 1]} : vector<14x84xf32> to vector<10x84xf32>
    %60 = arith.truncf %59 : vector<10x84xf32> to vector<10x84xbf16>
    %c192_51 = arith.constant 192 : index
    %c0_52 = arith.constant 0 : index
    %61 = vector.load %arg9[%c192_51, %c0_52] : memref<1264x160xbf16, #tpu.memory_space<vmem>>, vector<84x160xbf16>
    %cst_53 = arith.constant dense<0.000000e+00> : vector<10x160xf32>
    %62 = tpu.matmul %60, %61, %cst_53 {dimension_numbers = #tpu.dot_dimension_numbers<[1], [0], [0], [1], [0, 0, 1, 1], [], []>} : vector<10x84xbf16>, vector<84x160xbf16>, vector<10x160xf32> -> vector<10x160xf32>
    %63 = arith.addf %58, %62 : vector<10x160xf32>
    %64 = vector.extract_strided_slice %49 {offsets = [3, 0], sizes = [10, 84], strides = [1, 1]} : vector<14x84xf32> to vector<10x84xf32>
    %65 = arith.truncf %64 : vector<10x84xf32> to vector<10x84xbf16>
    %c288_54 = arith.constant 288 : index
    %c0_55 = arith.constant 0 : index
    %66 = vector.load %arg9[%c288_54, %c0_55] : memref<1264x160xbf16, #tpu.memory_space<vmem>>, vector<84x160xbf16>
    %cst_56 = arith.constant dense<0.000000e+00> : vector<10x160xf32>
    %67 = tpu.matmul %65, %66, %cst_56 {dimension_numbers = #tpu.dot_dimension_numbers<[1], [0], [0], [1], [0, 0, 1, 1], [], []>} : vector<10x84xbf16>, vector<84x160xbf16>, vector<10x160xf32> -> vector<10x160xf32>
    %68 = arith.addf %63, %67 : vector<10x160xf32>
    %69 = vector.extract_strided_slice %49 {offsets = [4, 0], sizes = [10, 84], strides = [1, 1]} : vector<14x84xf32> to vector<10x84xf32>
    %70 = arith.truncf %69 : vector<10x84xf32> to vector<10x84xbf16>
    %c384_57 = arith.constant 384 : index
    %c0_58 = arith.constant 0 : index
    %71 = vector.load %arg9[%c384_57, %c0_58] : memref<1264x160xbf16, #tpu.memory_space<vmem>>, vector<84x160xbf16>
    %cst_59 = arith.constant dense<0.000000e+00> : vector<10x160xf32>
    %72 = tpu.matmul %70, %71, %cst_59 {dimension_numbers = #tpu.dot_dimension_numbers<[1], [0], [0], [1], [0, 0, 1, 1], [], []>} : vector<10x84xbf16>, vector<84x160xbf16>, vector<10x160xf32> -> vector<10x160xf32>
    %73 = arith.addf %68, %72 : vector<10x160xf32>
    %c1_60 = arith.constant 1 : index
    %c0_61 = arith.constant 0 : index
    %74 = vector.load %arg1[%c1_60, %c0_61] : memref<5x168xf32, #tpu.memory_space<vmem>>, vector<1x160xf32>
    %75 = vector.broadcast %74 : vector<1x160xf32> to vector<10x160xf32>
    %76 = arith.addf %73, %75 : vector<10x160xf32>
    %cst_62 = arith.constant 0.000000e+00 : f32
    %77 = vector.broadcast %cst_62 : f32 to vector<10x160xf32>
    %78 = arith.maximumf %76, %77 : vector<10x160xf32>
    %79 = arith.truncf %78 : vector<10x160xf32> to vector<10x160xbf16>
    %c480_63 = arith.constant 480 : index
    %c0_64 = arith.constant 0 : index
    %80 = vector.load %arg9[%c480_63, %c0_64] : memref<1264x160xbf16, #tpu.memory_space<vmem>>, vector<160x160xbf16>
    %cst_65 = arith.constant dense<0.000000e+00> : vector<10x160xf32>
    %81 = tpu.matmul %79, %80, %cst_65 {dimension_numbers = #tpu.dot_dimension_numbers<[1], [0], [0], [1], [0, 0, 1, 1], [], []>} : vector<10x160xbf16>, vector<160x160xbf16>, vector<10x160xf32> -> vector<10x160xf32>
    %82 = vector.extract_strided_slice %81 {offsets = [0, 0], sizes = [10, 80], strides = [1, 1]} : vector<10x160xf32> to vector<10x80xf32>
    %83 = vector.extract_strided_slice %81 {offsets = [0, 80], sizes = [10, 80], strides = [1, 1]} : vector<10x160xf32> to vector<10x80xf32>
    %84 = arith.maximumf %82, %83 : vector<10x80xf32>
    %c0_66 = arith.constant 0 : index
    %c0_67 = arith.constant 0 : index
    %85 = vector.load %arg7[%c0_66, %c0_67] : memref<10x80xf32, #tpu.memory_space<vmem>>, vector<10x80xf32>
    tpu.vector_store %arg7[%c0_66, %c0_67], %84 {strides = array<i32>} : memref<10x80xf32, #tpu.memory_space<vmem>>, vector<10x80xf32>,
    %c0_68 = arith.constant 0 : index
    %c0_69 = arith.constant 0 : index
    %86 = tpu.strided_load %arg7[%c0_68, %c0_69] {strides = array<i32: 2, 1>} : memref<10x80xf32, #tpu.memory_space<vmem>>, vector<5x80xf32>
    %c1_70 = arith.constant 1 : index
    %c0_71 = arith.constant 0 : index
    %87 = tpu.strided_load %arg7[%c1_70, %c0_71] {strides = array<i32: 2, 1>} : memref<10x80xf32, #tpu.memory_space<vmem>>, vector<5x80xf32>
    %88 = arith.maximumf %86, %87 : vector<5x80xf32>
    %89 = vector.extract_strided_slice %88 {offsets = [0, 0], sizes = [1, 80], strides = [1, 1]} : vector<5x80xf32> to vector<1x80xf32>
    %c0_72 = arith.constant 0 : index
    %c0_73 = arith.constant 0 : index
    %90 = vector.load %arg8[%c0_72, %c0_73] : memref<1x400xf32, #tpu.memory_space<vmem>>, vector<1x80xf32>
    tpu.vector_store %arg8[%c0_72, %c0_73], %89 {strides = array<i32>} : memref<1x400xf32, #tpu.memory_space<vmem>>, vector<1x80xf32>,
    %91 = vector.extract_strided_slice %88 {offsets = [1, 0], sizes = [1, 80], strides = [1, 1]} : vector<5x80xf32> to vector<1x80xf32>
    %c0_74 = arith.constant 0 : index
    %c80 = arith.constant 80 : index
    %92 = vector.load %arg8[%c0_74, %c80] : memref<1x400xf32, #tpu.memory_space<vmem>>, vector<1x80xf32>
    tpu.vector_store %arg8[%c0_74, %c80], %91 {strides = array<i32>} : memref<1x400xf32, #tpu.memory_space<vmem>>, vector<1x80xf32>,
    %93 = vector.extract_strided_slice %88 {offsets = [2, 0], sizes = [1, 80], strides = [1, 1]} : vector<5x80xf32> to vector<1x80xf32>
    %c0_75 = arith.constant 0 : index
    %c160 = arith.constant 160 : index
    %94 = vector.load %arg8[%c0_75, %c160] : memref<1x400xf32, #tpu.memory_space<vmem>>, vector<1x80xf32>
    tpu.vector_store %arg8[%c0_75, %c160], %93 {strides = array<i32>} : memref<1x400xf32, #tpu.memory_space<vmem>>, vector<1x80xf32>,
    %95 = vector.extract_strided_slice %88 {offsets = [3, 0], sizes = [1, 80], strides = [1, 1]} : vector<5x80xf32> to vector<1x80xf32>
    %c0_76 = arith.constant 0 : index
    %c240 = arith.constant 240 : index
    %96 = vector.load %arg8[%c0_76, %c240] : memref<1x400xf32, #tpu.memory_space<vmem>>, vector<1x80xf32>
    tpu.vector_store %arg8[%c0_76, %c240], %95 {strides = array<i32>} : memref<1x400xf32, #tpu.memory_space<vmem>>, vector<1x80xf32>,
    %97 = vector.extract_strided_slice %88 {offsets = [4, 0], sizes = [1, 80], strides = [1, 1]} : vector<5x80xf32> to vector<1x80xf32>
    %c0_77 = arith.constant 0 : index
    %c320 = arith.constant 320 : index
    %98 = vector.load %arg8[%c0_77, %c320] : memref<1x400xf32, #tpu.memory_space<vmem>>, vector<1x80xf32>
    tpu.vector_store %arg8[%c0_77, %c320], %97 {strides = array<i32>} : memref<1x400xf32, #tpu.memory_space<vmem>>, vector<1x80xf32>,
    %c0_78 = arith.constant 0 : index
    %c0_79 = arith.constant 0 : index
    %99 = vector.load %arg8[%c0_78, %c0_79] : memref<1x400xf32, #tpu.memory_space<vmem>>, vector<1x400xf32>
    %100 = arith.truncf %99 : vector<1x400xf32> to vector<1x400xbf16>
    %c640 = arith.constant 640 : index
    %c0_80 = arith.constant 0 : index
    %101 = vector.load %arg9[%c640, %c0_80] : memref<1264x160xbf16, #tpu.memory_space<vmem>>, vector<400x120xbf16>
    %cst_81 = arith.constant dense<0.000000e+00> : vector<1x120xf32>
    %102 = tpu.matmul %100, %101, %cst_81 {dimension_numbers = #tpu.dot_dimension_numbers<[1], [0], [0], [1], [0, 0, 1, 1], [], []>} : vector<1x400xbf16>, vector<400x120xbf16>, vector<1x120xf32> -> vector<1x120xf32>
    %c2_82 = arith.constant 2 : index
    %c0_83 = arith.constant 0 : index
    %103 = vector.load %arg1[%c2_82, %c0_83] : memref<5x168xf32, #tpu.memory_space<vmem>>, vector<1x120xf32>
    %104 = arith.addf %102, %103 : vector<1x120xf32>
    %cst_84 = arith.constant 0.000000e+00 : f32
    %105 = vector.broadcast %cst_84 : f32 to vector<1x120xf32>
    %106 = arith.maximumf %104, %105 : vector<1x120xf32>
    %107 = arith.truncf %106 : vector<1x120xf32> to vector<1x120xbf16>
    %c1040 = arith.constant 1040 : index
    %c0_85 = arith.constant 0 : index
    %108 = vector.load %arg9[%c1040, %c0_85] : memref<1264x160xbf16, #tpu.memory_space<vmem>>, vector<120x84xbf16>
    %cst_86 = arith.constant dense<0.000000e+00> : vector<1x84xf32>
    %109 = tpu.matmul %107, %108, %cst_86 {dimension_numbers = #tpu.dot_dimension_numbers<[1], [0], [0], [1], [0, 0, 1, 1], [], []>} : vector<1x120xbf16>, vector<120x84xbf16>, vector<1x84xf32> -> vector<1x84xf32>
    %c3_87 = arith.constant 3 : index
    %c0_88 = arith.constant 0 : index
    %110 = vector.load %arg1[%c3_87, %c0_88] : memref<5x168xf32, #tpu.memory_space<vmem>>, vector<1x84xf32>
    %111 = arith.addf %109, %110 : vector<1x84xf32>
    %cst_89 = arith.constant 0.000000e+00 : f32
    %112 = vector.broadcast %cst_89 : f32 to vector<1x84xf32>
    %113 = arith.maximumf %111, %112 : vector<1x84xf32>
    %114 = arith.truncf %113 : vector<1x84xf32> to vector<1x84xbf16>
    %c1168 = arith.constant 1168 : index
    %c0_90 = arith.constant 0 : index
    %115 = vector.load %arg9[%c1168, %c0_90] : memref<1264x160xbf16, #tpu.memory_space<vmem>>, vector<84x10xbf16>
    %cst_91 = arith.constant dense<0.000000e+00> : vector<1x10xf32>
    %116 = tpu.matmul %114, %115, %cst_91 {dimension_numbers = #tpu.dot_dimension_numbers<[1], [0], [0], [1], [0, 0, 1, 1], [], []>} : vector<1x84xbf16>, vector<84x10xbf16>, vector<1x10xf32> -> vector<1x10xf32>
    %c4_92 = arith.constant 4 : index
    %c0_93 = arith.constant 0 : index
    %117 = vector.load %arg1[%c4_92, %c0_93] : memref<5x168xf32, #tpu.memory_space<vmem>>, vector<1x10xf32>
    %118 = arith.addf %116, %117 : vector<1x10xf32>
    %c0_94 = arith.constant 0 : index
    %c0_95 = arith.constant 0 : index
    %119 = vector.load %arg4[%c0_94, %c0_95] : memref<1x10xf32, #tpu.memory_space<vmem>>, vector<1x10xf32>
    tpu.vector_store %arg4[%c0_94, %c0_95], %118 {strides = array<i32>} : memref<1x10xf32, #tpu.memory_space<vmem>>, vector<1x10xf32>,
    return
  }
}

</mosaic_0001>

<bundles_post_ra>
// kernel: cnn_forward_pallas.1
= control target key start
LH: loop header
LB: loop body
LE: loop exit
PB: predicated region body
PF: predicated region fallthrough
CT: control target
= control target key end

     0   :  { %9 = vsyncpa [#allocation9], 0  ;;  %s3618_s11 = smov 56   ;;  %s3619_s12 = smov 28   ;;  %vm1329_vm0 = vcmask 687104   ;;  %s4705_s0 = inlined_call_operand.vmem [shape: f32[1,3,28,28], index: 0, kind: input, shape index: {}]   ;;  %s4706_s1 = inlined_call_operand.vmem [shape: f32[5,168], index: 1, kind: input, shape index: {}]   ;;  %s4707_s2 = inlined_call_operand.vmem [shape: bf16[656,168], index: 2, kind: input, shape index: {}]   ;;  %s4708_s3 = inlined_call_operand.vmem [shape: bf16[1264,160], index: 3, kind: input, shape index: {}]   ;;  %s4709_s4 = inlined_call_operand.hbm [shape: f32[1,10], index: 4, kind: output, shape index: {}]  }
   0x1   :  { %v34_v0 = vld [vmem:[%s4708_s3] sm:$0xf]  ;;  %v36_v1 = vld [vmem:[%s4708_s3 + $0x8] sm:$0xf]  ;;  %v38_v2 = vld [vmem:[%s4708_s3 + $0x4] sm:$0xf] }
   0x2   :  { %35 = vst [vmem:[#allocation6] sm:$0xf] %v34_v0  ;;  %37 = vst [vmem:[#allocation6 + $0x4] sm:$0xf] %v36_v1  ;;  %v40_v3 = vld [vmem:[%s4708_s3 + $0xc] sm:$0xff]   ;;  %v48_v6 = vld [vmem:[%s4708_s3 + $0x1c] sm:$0xff]  }
   0x3   :  { %v44_v4 = vld [vmem:[%s4708_s3 + $0x18] sm:$0xf]  ;;  %39 = vst [vmem:[#allocation6 + $0x8] sm:$0xf] %v38_v2  ;;  %41 = vst [vmem:[#allocation6 + $0xc] sm:$0xff] %v40_v3   ;;  %v56_v9 = vld [vmem:[%s4708_s3 + $0x2c] sm:$0xff]  }
   0x4   :  { %45 = vst [vmem:[#allocation6 + $0x14] sm:$0xf] %v44_v4  ;;  %v46_v5 = vld [vmem:[%s4708_s3 + $0x14] sm:$0xf]  ;;  %v52_v7 = vld [vmem:[%s4708_s3 + $0x28] sm:$0xf] }
   0x5   :  { %47 = vst [vmem:[#allocation6 + $0x18] sm:$0xf] %v46_v5  ;;  %49 = vst [vmem:[#allocation6 + $0x1c] sm:$0xff] %v48_v6   ;;  %v54_v8 = vld [vmem:[%s4708_s3 + $0x24] sm:$0xf]  ;;  %v64_v12 = vld [vmem:[%s4708_s3 + $0x3c] sm:$0xff]  }
   0x6   :  { %53 = vst [vmem:[#allocation6 + $0x24] sm:$0xf] %v52_v7  ;;  %v60_v10 = vld [vmem:[%s4708_s3 + $0x38] sm:$0xf]  ;;  %55 = vst [vmem:[#allocation6 + $0x28] sm:$0xf] %v54_v8 }
   0x7   :  { %57 = vst [vmem:[#allocation6 + $0x2c] sm:$0xff] %v56_v9   ;;  %61 = vst [vmem:[#allocation6 + $0x34] sm:$0xf] %v60_v10  ;;  %v62_v11 = vld [vmem:[%s4708_s3 + $0x34] sm:$0xf]  ;;  %v72_v15 = vld [vmem:[%s4708_s3 + $0x4c] sm:$0xff]  }
   0x8   :  { %v68_v13 = vld [vmem:[%s4708_s3 + $0x48] sm:$0xf]  ;;  %63 = vst [vmem:[#allocation6 + $0x38] sm:$0xf] %v62_v11  ;;  %65 = vst [vmem:[#allocation6 + $0x3c] sm:$0xff] %v64_v12   ;;  %v80_v17 = vld [vmem:[%s4708_s3 + $0x5c] sm:$0xff]  }
   0x9   :  { %69 = vst [vmem:[#allocation6 + $0x44] sm:$0xf] %v68_v13  ;;  %v70_v14 = vld [vmem:[%s4708_s3 + $0x44] sm:$0xf]  ;;  %73 = vst [vmem:[#allocation6 + $0x4c] sm:$0xff] %v72_v15   ;;  %v88_v20 = vld [vmem:[%s4708_s3 + $0x6c] sm:$0xff]  }
   0xa   :  { %71 = vst [vmem:[#allocation6 + $0x48] sm:$0xf] %v70_v14  ;;  %v78_v16 = vld [vmem:[%s4708_s3 + $0x54] sm:$0xf]  ;;  %v84_v18 = vld [vmem:[%s4708_s3 + $0x68] sm:$0xf] }
   0xb   :  { %79 = vst [vmem:[#allocation6 + $0x58] sm:$0xf] %v78_v16  ;;  %81 = vst [vmem:[#allocation6 + $0x5c] sm:$0xff] %v80_v17   ;;  %v86_v19 = vld [vmem:[%s4708_s3 + $0x64] sm:$0xf]  ;;  %v96_v23 = vld [vmem:[%s4708_s3 + $0x7c] sm:$0xff]  }
   0xc   :  { %85 = vst [vmem:[#allocation6 + $0x64] sm:$0xf] %v84_v18  ;;  %v92_v21 = vld [vmem:[%s4708_s3 + $0x78] sm:$0xf]  ;;  %87 = vst [vmem:[#allocation6 + $0x68] sm:$0xf] %v86_v19 }
   0xd   :  { %89 = vst [vmem:[#allocation6 + $0x6c] sm:$0xff] %v88_v20   ;;  %93 = vst [vmem:[#allocation6 + $0x74] sm:$0xf] %v92_v21  ;;  %v94_v22 = vld [vmem:[%s4708_s3 + $0x74] sm:$0xf]  ;;  %v104_v26 = vld [vmem:[%s4708_s3 + $0x8c] sm:$0xff]  }
   0xe   :  { %v100_v24 = vld [vmem:[%s4708_s3 + $0x88] sm:$0xf]  ;;  %95 = vst [vmem:[#allocation6 + $0x78] sm:$0xf] %v94_v22  ;;  %97 = vst [vmem:[#allocation6 + $0x7c] sm:$0xff] %v96_v23   ;;  %v112_v29 = vld [vmem:[%s4708_s3 + $0x9c] sm:$0xff]  }
   0xf   :  { %101 = vst [vmem:[#allocation6 + $0x84] sm:$0xf] %v100_v24  ;;  %v102_v25 = vld [vmem:[%s4708_s3 + $0x84] sm:$0xf]  ;;  %v108_v27 = vld [vmem:[%s4708_s3 + $0x98] sm:$0xf] }
  0x10   :  { %103 = vst [vmem:[#allocation6 + $0x88] sm:$0xf] %v102_v25  ;;  %105 = vst [vmem:[#allocation6 + $0x8c] sm:$0xff] %v104_v26   ;;  %v110_v28 = vld [vmem:[%s4708_s3 + $0x94] sm:$0xf]  ;;  %v120_v32 = vld [vmem:[%s4708_s3 + $0xac] sm:$0xff]  }
  0x11   :  { %109 = vst [vmem:[#allocation6 + $0x94] sm:$0xf] %v108_v27  ;;  %v116_v30 = vld [vmem:[%s4708_s3 + $0xa8] sm:$0xf]  ;;  %111 = vst [vmem:[#allocation6 + $0x98] sm:$0xf] %v110_v28 }
  0x12   :  { %113 = vst [vmem:[#allocation6 + $0x9c] sm:$0xff] %v112_v29   ;;  %117 = vst [vmem:[#allocation6 + $0xa4] sm:$0xf] %v116_v30  ;;  %v118_v31 = vld [vmem:[%s4708_s3 + $0xa4] sm:$0xf]  ;;  %v128_v34 = vld [vmem:[%s4708_s3 + $0xbc] sm:$0xff]  }
  0x13   :  { %119 = vst [vmem:[#allocation6 + $0xa8] sm:$0xf] %v118_v31  ;;  %121 = vst [vmem:[#allocation6 + $0xac] sm:$0xff] %v120_v32   ;;  %v126_v33 = vld [vmem:[%s4708_s3 + $0xb4] sm:$0xf]  ;;  %v136_v37 = vld [vmem:[%s4708_s3 + $0xcc] sm:$0xff]  }
  0x14   :  { %v132_v35 = vld [vmem:[%s4708_s3 + $0xc8] sm:$0xf]  ;;  %127 = vst [vmem:[#allocation6 + $0xb8] sm:$0xf] %v126_v33  ;;  %129 = vst [vmem:[#allocation6 + $0xbc] sm:$0xff] %v128_v34   ;;  %v144_v40 = vld [vmem:[%s4708_s3 + $0xdc] sm:$0xff]  }
  0x15   :  { %133 = vst [vmem:[#allocation6 + $0xc4] sm:$0xf] %v132_v35  ;;  %v134_v36 = vld [vmem:[%s4708_s3 + $0xc4] sm:$0xf]  ;;  %v140_v38 = vld [vmem:[%s4708_s3 + $0xd8] sm:$0xf] }
  0x16   :  { %135 = vst [vmem:[#allocation6 + $0xc8] sm:$0xf] %v134_v36  ;;  %137 = vst [vmem:[#allocation6 + $0xcc] sm:$0xff] %v136_v37   ;;  %v142_v39 = vld [vmem:[%s4708_s3 + $0xd4] sm:$0xf]  ;;  %v152_v43 = vld [vmem:[%s4708_s3 + $0xec] sm:$0xff]  }
  0x17   :  { %141 = vst [vmem:[#allocation6 + $0xd4] sm:$0xf] %v140_v38  ;;  %v148_v41 = vld [vmem:[%s4708_s3 + $0xe8] sm:$0xf]  ;;  %143 = vst [vmem:[#allocation6 + $0xd8] sm:$0xf] %v142_v39 }
  0x18   :  { %145 = vst [vmem:[#allocation6 + $0xdc] sm:$0xff] %v144_v40   ;;  %149 = vst [vmem:[#allocation6 + $0xe4] sm:$0xf] %v148_v41  ;;  %v150_v42 = vld [vmem:[%s4708_s3 + $0xe4] sm:$0xf]  ;;  %v160_v46 = vld [vmem:[%s4708_s3 + $0xfc] sm:$0xff]  }
  0x19   :  { %v156_v44 = vld [vmem:[%s4708_s3 + $0xf8] sm:$0xf]  ;;  %151 = vst [vmem:[#allocation6 + $0xe8] sm:$0xf] %v150_v42  ;;  %153 = vst [vmem:[#allocation6 + $0xec] sm:$0xff] %v152_v43   ;;  %v168_v49 = vld [vmem:[%s4708_s3 + $0x10c] sm:$0xff]  }
  0x1a   :  { %157 = vst [vmem:[#allocation6 + $0xf4] sm:$0xf] %v156_v44  ;;  %v158_v45 = vld [vmem:[%s4708_s3 + $0xf4] sm:$0xf]  ;;  %v164_v47 = vld [vmem:[%s4708_s3 + $0x108] sm:$0xf] }
  0x1b   :  { %159 = vst [vmem:[#allocation6 + $0xf8] sm:$0xf] %v158_v45  ;;  %161 = vst [vmem:[#allocation6 + $0xfc] sm:$0xff] %v160_v46   ;;  %v166_v48 = vld [vmem:[%s4708_s3 + $0x104] sm:$0xf]  ;;  %v176_v51 = vld [vmem:[%s4708_s3 + $0x11c] sm:$0xff]  }
  0x1c   :  { %165 = vst [vmem:[#allocation6 + $0x104] sm:$0xf] %v164_v47  ;;  %167 = vst [vmem:[#allocation6 + $0x108] sm:$0xf] %v166_v48  ;;  %v174_v50 = vld [vmem:[%s4708_s3 + $0x114] sm:$0xf] }
  0x1d   :  { %169 = vst [vmem:[#allocation6 + $0x10c] sm:$0xff] %v168_v49   ;;  %v180_v52 = vld [vmem:[%s4708_s3 + $0x128] sm:$0xf]  ;;  %175 = vst [vmem:[#allocation6 + $0x118] sm:$0xf] %v174_v50  ;;  %v184_v54 = vld [vmem:[%s4708_s3 + $0x12c] sm:$0xff]  }
  0x1e   :  { %177 = vst [vmem:[#allocation6 + $0x11c] sm:$0xff] %v176_v51   ;;  %181 = vst [vmem:[#allocation6 + $0x124] sm:$0xf] %v180_v52  ;;  %v182_v53 = vld [vmem:[%s4708_s3 + $0x124] sm:$0xf]  ;;  %v192_v57 = vld [vmem:[%s4708_s3 + $0x13c] sm:$0xff]  }
  0x1f   :  { %v188_v55 = vld [vmem:[%s4708_s3 + $0x138] sm:$0xf]  ;;  %183 = vst [vmem:[#allocation6 + $0x128] sm:$0xf] %v182_v53  ;;  %185 = vst [vmem:[#allocation6 + $0x12c] sm:$0xff] %v184_v54   ;;  %v200_v60 = vld [vmem:[%s4708_s3 + $0x14c] sm:$0xff]  }
  0x20   :  { %189 = vst [vmem:[#allocation6 + $0x134] sm:$0xf] %v188_v55  ;;  %v190_v56 = vld [vmem:[%s4708_s3 + $0x134] sm:$0xf]  ;;  %v196_v58 = vld [vmem:[%s4708_s3 + $0x148] sm:$0xf] }
  0x21   :  { %191 = vst [vmem:[#allocation6 + $0x138] sm:$0xf] %v190_v56  ;;  %193 = vst [vmem:[#allocation6 + $0x13c] sm:$0xff] %v192_v57   ;;  %v198_v59 = vld [vmem:[%s4708_s3 + $0x144] sm:$0xf]  ;;  %v208_v63 = vld [vmem:[%s4708_s3 + $0x15c] sm:$0xff]  }
  0x22   :  { %197 = vst [vmem:[#allocation6 + $0x144] sm:$0xf] %v196_v58  ;;  %v204_v61 = vld [vmem:[%s4708_s3 + $0x158] sm:$0xf]  ;;  %199 = vst [vmem:[#allocation6 + $0x148] sm:$0xf] %v198_v59 }
  0x23   :  { %201 = vst [vmem:[#allocation6 + $0x14c] sm:$0xff] %v200_v60   ;;  %205 = vst [vmem:[#allocation6 + $0x154] sm:$0xf] %v204_v61  ;;  %v206_v62 = vld [vmem:[%s4708_s3 + $0x154] sm:$0xf]  ;;  %v216_v2 = vld [vmem:[%s4708_s3 + $0x16c] sm:$0xff]  }
  0x24   :  { %v212_v0 = vld [vmem:[%s4708_s3 + $0x168] sm:$0xf]  ;;  %207 = vst [vmem:[#allocation6 + $0x158] sm:$0xf] %v206_v62  ;;  %209 = vst [vmem:[#allocation6 + $0x15c] sm:$0xff] %v208_v63   ;;  %v224_v4 = vld [vmem:[%s4708_s3 + $0x17c] sm:$0xff]  }
  0x25   :  { %213 = vst [vmem:[#allocation6 + $0x164] sm:$0xf] %v212_v0  ;;  %v214_v1 = vld [vmem:[%s4708_s3 + $0x164] sm:$0xf]  ;;  %217 = vst [vmem:[#allocation6 + $0x16c] sm:$0xff] %v216_v2   ;;  %v232_v7 = vld [vmem:[%s4708_s3 + $0x18c] sm:$0xff]  }
  0x26   :  { %215 = vst [vmem:[#allocation6 + $0x168] sm:$0xf] %v214_v1  ;;  %v222_v3 = vld [vmem:[%s4708_s3 + $0x174] sm:$0xf]  ;;  %v228_v5 = vld [vmem:[%s4708_s3 + $0x188] sm:$0xf] }
  0x27   :  { %223 = vst [vmem:[#allocation6 + $0x178] sm:$0xf] %v222_v3  ;;  %225 = vst [vmem:[#allocation6 + $0x17c] sm:$0xff] %v224_v4   ;;  %v230_v6 = vld [vmem:[%s4708_s3 + $0x184] sm:$0xf]  ;;  %v240_v10 = vld [vmem:[%s4708_s3 + $0x19c] sm:$0xff]  }
  0x28   :  { %229 = vst [vmem:[#allocation6 + $0x184] sm:$0xf] %v228_v5  ;;  %v236_v8 = vld [vmem:[%s4708_s3 + $0x198] sm:$0xf]  ;;  %231 = vst [vmem:[#allocation6 + $0x188] sm:$0xf] %v230_v6 }
  0x29   :  { %233 = vst [vmem:[#allocation6 + $0x18c] sm:$0xff] %v232_v7   ;;  %237 = vst [vmem:[#allocation6 + $0x194] sm:$0xf] %v236_v8  ;;  %v238_v9 = vld [vmem:[%s4708_s3 + $0x194] sm:$0xf]  ;;  %v248_v13 = vld [vmem:[%s4708_s3 + $0x1ac] sm:$0xff]  }
  0x2a   :  { %v244_v11 = vld [vmem:[%s4708_s3 + $0x1a8] sm:$0xf]  ;;  %239 = vst [vmem:[#allocation6 + $0x198] sm:$0xf] %v238_v9  ;;  %241 = vst [vmem:[#allocation6 + $0x19c] sm:$0xff] %v240_v10   ;;  %v256_v16 = vld [vmem:[%s4708_s3 + $0x1bc] sm:$0xff]  }
  0x2b   :  { %245 = vst [vmem:[#allocation6 + $0x1a4] sm:$0xf] %v244_v11  ;;  %v246_v12 = vld [vmem:[%s4708_s3 + $0x1a4] sm:$0xf]  ;;  %v252_v14 = vld [vmem:[%s4708_s3 + $0x1b8] sm:$0xf] }
  0x2c   :  { %247 = vst [vmem:[#allocation6 + $0x1a8] sm:$0xf] %v246_v12  ;;  %249 = vst [vmem:[#allocation6 + $0x1ac] sm:$0xff] %v248_v13   ;;  %v254_v15 = vld [vmem:[%s4708_s3 + $0x1b4] sm:$0xf]  ;;  %v264_v19 = vld [vmem:[%s4708_s3 + $0x1cc] sm:$0xff]  }
  0x2d   :  { %253 = vst [vmem:[#allocation6 + $0x1b4] sm:$0xf] %v252_v14  ;;  %v260_v17 = vld [vmem:[%s4708_s3 + $0x1c8] sm:$0xf]  ;;  %255 = vst [vmem:[#allocation6 + $0x1b8] sm:$0xf] %v254_v15 }
  0x2e   :  { %257 = vst [vmem:[#allocation6 + $0x1bc] sm:$0xff] %v256_v16   ;;  %261 = vst [vmem:[#allocation6 + $0x1c4] sm:$0xf] %v260_v17  ;;  %v262_v18 = vld [vmem:[%s4708_s3 + $0x1c4] sm:$0xf]  ;;  %v272_v21 = vld [vmem:[%s4708_s3 + $0x1dc] sm:$0xff]  }
  0x2f   :  { %263 = vst [vmem:[#allocation6 + $0x1c8] sm:$0xf] %v262_v18  ;;  %265 = vst [vmem:[#allocation6 + $0x1cc] sm:$0xff] %v264_v19   ;;  %v270_v20 = vld [vmem:[%s4708_s3 + $0x1d4] sm:$0xf]  ;;  %v280_v24 = vld [vmem:[%s4708_s3 + $0x1ec] sm:$0xff]  }
  0x30   :  { %v276_v22 = vld [vmem:[%s4708_s3 + $0x1e8] sm:$0xf]  ;;  %271 = vst [vmem:[#allocation6 + $0x1d8] sm:$0xf] %v270_v20  ;;  %273 = vst [vmem:[#allocation6 + $0x1dc] sm:$0xff] %v272_v21   ;;  %v288_v27 = vld [vmem:[%s4708_s3 + $0x1fc] sm:$0xff]  }
  0x31   :  { %277 = vst [vmem:[#allocation6 + $0x1e4] sm:$0xf] %v276_v22  ;;  %v278_v23 = vld [vmem:[%s4708_s3 + $0x1e4] sm:$0xf]  ;;  %v284_v25 = vld [vmem:[%s4708_s3 + $0x1f8] sm:$0xf] }
  0x32   :  { %279 = vst [vmem:[#allocation6 + $0x1e8] sm:$0xf] %v278_v23  ;;  %281 = vst [vmem:[#allocation6 + $0x1ec] sm:$0xff] %v280_v24   ;;  %v286_v26 = vld [vmem:[%s4708_s3 + $0x1f4] sm:$0xf]  ;;  %v296_v30 = vld [vmem:[%s4708_s3 + $0x20c] sm:$0xff]  }
  0x33   :  { %285 = vst [vmem:[#allocation6 + $0x1f4] sm:$0xf] %v284_v25  ;;  %v292_v28 = vld [vmem:[%s4708_s3 + $0x208] sm:$0xf]  ;;  %287 = vst [vmem:[#allocation6 + $0x1f8] sm:$0xf] %v286_v26 }
  0x34   :  { %289 = vst [vmem:[#allocation6 + $0x1fc] sm:$0xff] %v288_v27   ;;  %293 = vst [vmem:[#allocation6 + $0x204] sm:$0xf] %v292_v28  ;;  %v294_v29 = vld [vmem:[%s4708_s3 + $0x204] sm:$0xf]  ;;  %v304_v33 = vld [vmem:[%s4708_s3 + $0x21c] sm:$0xff]  }
  0x35   :  { %v300_v31 = vld [vmem:[%s4708_s3 + $0x218] sm:$0xf]  ;;  %295 = vst [vmem:[#allocation6 + $0x208] sm:$0xf] %v294_v29  ;;  %297 = vst [vmem:[#allocation6 + $0x20c] sm:$0xff] %v296_v30   ;;  %v312_v36 = vld [vmem:[%s4708_s3 + $0x22c] sm:$0xff]  }
  0x36   :  { %301 = vst [vmem:[#allocation6 + $0x214] sm:$0xf] %v300_v31  ;;  %v302_v32 = vld [vmem:[%s4708_s3 + $0x214] sm:$0xf]  ;;  %v308_v34 = vld [vmem:[%s4708_s3 + $0x228] sm:$0xf] }
  0x37   :  { %303 = vst [vmem:[#allocation6 + $0x218] sm:$0xf] %v302_v32  ;;  %305 = vst [vmem:[#allocation6 + $0x21c] sm:$0xff] %v304_v33   ;;  %v310_v35 = vld [vmem:[%s4708_s3 + $0x224] sm:$0xf]  ;;  %v320_v39 = vld [vmem:[%s4708_s3 + $0x23c] sm:$0xff]  }
  0x38   :  { %309 = vst [vmem:[#allocation6 + $0x224] sm:$0xf] %v308_v34  ;;  %v316_v37 = vld [vmem:[%s4708_s3 + $0x238] sm:$0xf]  ;;  %311 = vst [vmem:[#allocation6 + $0x228] sm:$0xf] %v310_v35 }
  0x39   :  { %313 = vst [vmem:[#allocation6 + $0x22c] sm:$0xff] %v312_v36   ;;  %317 = vst [vmem:[#allocation6 + $0x234] sm:$0xf] %v316_v37  ;;  %v318_v38 = vld [vmem:[%s4708_s3 + $0x234] sm:$0xf]  ;;  %v328_v42 = vld [vmem:[%s4708_s3 + $0x24c] sm:$0xff]  }
  0x3a   :  { %v324_v40 = vld [vmem:[%s4708_s3 + $0x248] sm:$0xf]  ;;  %319 = vst [vmem:[#allocation6 + $0x238] sm:$0xf] %v318_v38  ;;  %321 = vst [vmem:[#allocation6 + $0x23c] sm:$0xff] %v320_v39   ;;  %v336_v45 = vld [vmem:[%s4708_s3 + $0x25c] sm:$0xff]  }
  0x3b   :  { %325 = vst [vmem:[#allocation6 + $0x244] sm:$0xf] %v324_v40  ;;  %v326_v41 = vld [vmem:[%s4708_s3 + $0x244] sm:$0xf]  ;;  %v332_v43 = vld [vmem:[%s4708_s3 + $0x258] sm:$0xf] }
  0x3c   :  { %327 = vst [vmem:[#allocation6 + $0x248] sm:$0xf] %v326_v41  ;;  %329 = vst [vmem:[#allocation6 + $0x24c] sm:$0xff] %v328_v42   ;;  %v334_v44 = vld [vmem:[%s4708_s3 + $0x254] sm:$0xf]  ;;  %v344_v48 = vld [vmem:[%s4708_s3 + $0x26c] sm:$0xff]  }
  0x3d   :  { %333 = vst [vmem:[#allocation6 + $0x254] sm:$0xf] %v332_v43  ;;  %v340_v46 = vld [vmem:[%s4708_s3 + $0x268] sm:$0xf]  ;;  %335 = vst [vmem:[#allocation6 + $0x258] sm:$0xf] %v334_v44 }
  0x3e   :  { %337 = vst [vmem:[#allocation6 + $0x25c] sm:$0xff] %v336_v45   ;;  %341 = vst [vmem:[#allocation6 + $0x264] sm:$0xf] %v340_v46  ;;  %v342_v47 = vld [vmem:[%s4708_s3 + $0x264] sm:$0xf]  ;;  %v352_v51 = vld [vmem:[%s4708_s3 + $0x27c] sm:$0xff]  }
  0x3f   :  { %v348_v49 = vld [vmem:[%s4708_s3 + $0x278] sm:$0xf]  ;;  %343 = vst [vmem:[#allocation6 + $0x268] sm:$0xf] %v342_v47  ;;  %345 = vst [vmem:[#allocation6 + $0x26c] sm:$0xff] %v344_v48   ;;  %v360_v53 = vld [vmem:[%s4708_s3 + $0x28c] sm:$0xff]  }
  0x40   :  { %349 = vst [vmem:[#allocation6 + $0x274] sm:$0xf] %v348_v49  ;;  %v350_v50 = vld [vmem:[%s4708_s3 + $0x274] sm:$0xf]  ;;  %v356_v52 = vld [vmem:[%s4708_s3 + $0x288] sm:$0xf] }
  0x41   :  { %351 = vst [vmem:[#allocation6 + $0x278] sm:$0xf] %v350_v50  ;;  %353 = vst [vmem:[#allocation6 + $0x27c] sm:$0xff] %v352_v51   ;;  %v364_v54 = vld [vmem:[%s4708_s3 + $0x298] sm:$0xf]  ;;  %v368_v55 = vld [vmem:[%s4708_s3 + $0x29c] sm:$0xff]  }
  0x42   :  { %357 = vst [vmem:[#allocation6 + $0x284] sm:$0xf] %v356_v52  ;;  %361 = vst [vmem:[#allocation6 + $0x28c] sm:$0xff] %v360_v53   ;;  %v372_v56 = vld [vmem:[%s4708_s3 + $0x2a8] sm:$0xf]  ;;  %v376_v57 = vld [vmem:[%s4708_s3 + $0x2ac] sm:$0xff]  }
  0x43   :  { %365 = vst [vmem:[#allocation6 + $0x294] sm:$0xf] %v364_v54  ;;  %369 = vst [vmem:[#allocation6 + $0x29c] sm:$0xff] %v368_v55   ;;  %v380_v58 = vld [vmem:[%s4708_s3 + $0x2b8] sm:$0xf]  ;;  %v384_v59 = vld [vmem:[%s4708_s3 + $0x2bc] sm:$0xff]  }
  0x44   :  { %373 = vst [vmem:[#allocation6 + $0x2a4] sm:$0xf] %v372_v56  ;;  %377 = vst [vmem:[#allocation6 + $0x2ac] sm:$0xff] %v376_v57   ;;  %v388_v60 = vld [vmem:[%s4708_s3 + $0x2c8] sm:$0xf]  ;;  %v392_v61 = vld [vmem:[%s4708_s3 + $0x2cc] sm:$0xff]  }
  0x45   :  { %381 = vst [vmem:[#allocation6 + $0x2b4] sm:$0xf] %v380_v58  ;;  %385 = vst [vmem:[#allocation6 + $0x2bc] sm:$0xff] %v384_v59   ;;  %v396_v62 = vld [vmem:[%s4708_s3 + $0x2d8] sm:$0xf]  ;;  %v400_v63 = vld [vmem:[%s4708_s3 + $0x2dc] sm:$0xff]  }
  0x46   :  { %389 = vst [vmem:[#allocation6 + $0x2c4] sm:$0xf] %v388_v60  ;;  %393 = vst [vmem:[#allocation6 + $0x2cc] sm:$0xff] %v392_v61   ;;  %v404_v0 = vld [vmem:[%s4708_s3 + $0x2e8] sm:$0xf]  ;;  %v408_v1 = vld [vmem:[%s4708_s3 + $0x2ec] sm:$0xff]  }
  0x47   :  { %397 = vst [vmem:[#allocation6 + $0x2d4] sm:$0xf] %v396_v62  ;;  %401 = vst [vmem:[#allocation6 + $0x2dc] sm:$0xff] %v400_v63   ;;  %v412_v2 = vld [vmem:[%s4708_s3 + $0x2f8] sm:$0xf]  ;;  %v416_v3 = vld [vmem:[%s4708_s3 + $0x2fc] sm:$0xff]  }
  0x48   :  { %405 = vst [vmem:[#allocation6 + $0x2e4] sm:$0xf] %v404_v0  ;;  %409 = vst [vmem:[#allocation6 + $0x2ec] sm:$0xff] %v408_v1   ;;  %v420_v4 = vld [vmem:[%s4708_s3 + $0x308] sm:$0xf]  ;;  %v424_v5 = vld [vmem:[%s4708_s3 + $0x30c] sm:$0xff]  }
  0x49   :  { %413 = vst [vmem:[#allocation6 + $0x2f4] sm:$0xf] %v412_v2  ;;  %417 = vst [vmem:[#allocation6 + $0x2fc] sm:$0xff] %v416_v3   ;;  %v428_v6 = vld [vmem:[%s4708_s3 + $0x318] sm:$0xf]  ;;  %v432_v7 = vld [vmem:[%s4708_s3 + $0x31c] sm:$0xff]  }
  0x4a   :  { %421 = vst [vmem:[#allocation6 + $0x304] sm:$0xf] %v420_v4  ;;  %425 = vst [vmem:[#allocation6 + $0x30c] sm:$0xff] %v424_v5   ;;  %v436_v8 = vld [vmem:[%s4708_s3 + $0x328] sm:$0xf]  ;;  %v440_v9 = vld [vmem:[%s4708_s3 + $0x32c] sm:$0xff]  }
  0x4b   :  { %429 = vst [vmem:[#allocation6 + $0x314] sm:$0xf] %v428_v6  ;;  %433 = vst [vmem:[#allocation6 + $0x31c] sm:$0xff] %v432_v7   ;;  %v444_v10 = vld [vmem:[%s4708_s3 + $0x338] sm:$0xf]  ;;  %v448_v11 = vld [vmem:[%s4708_s3 + $0x33c] sm:$0xff]  }
  0x4c   :  { %437 = vst [vmem:[#allocation6 + $0x324] sm:$0xf] %v436_v8  ;;  %441 = vst [vmem:[#allocation6 + $0x32c] sm:$0xff] %v440_v9   ;;  %v452_v12 = vld [vmem:[%s4708_s3 + $0x348] sm:$0xf]  ;;  %v456_v13 = vld [vmem:[%s4708_s3 + $0x34c] sm:$0xff]  }
  0x4d   :  { %445 = vst [vmem:[#allocation6 + $0x334] sm:$0xf] %v444_v10  ;;  %449 = vst [vmem:[#allocation6 + $0x33c] sm:$0xff] %v448_v11   ;;  %v460_v14 = vld [vmem:[%s4708_s3 + $0x358] sm:$0xf]  ;;  %v464_v15 = vld [vmem:[%s4708_s3 + $0x35c] sm:$0xff]  }
  0x4e   :  { %453 = vst [vmem:[#allocation6 + $0x344] sm:$0xf] %v452_v12  ;;  %457 = vst [vmem:[#allocation6 + $0x34c] sm:$0xff] %v456_v13   ;;  %v468_v16 = vld [vmem:[%s4708_s3 + $0x368] sm:$0xf]  ;;  %v472_v17 = vld [vmem:[%s4708_s3 + $0x36c] sm:$0xff]  }
  0x4f   :  { %461 = vst [vmem:[#allocation6 + $0x354] sm:$0xf] %v460_v14  ;;  %465 = vst [vmem:[#allocation6 + $0x35c] sm:$0xff] %v464_v15   ;;  %v476_v18 = vld [vmem:[%s4708_s3 + $0x378] sm:$0xf]  ;;  %v480_v19 = vld [vmem:[%s4708_s3 + $0x37c] sm:$0xff]  }
  0x50   :  { %469 = vst [vmem:[#allocation6 + $0x364] sm:$0xf] %v468_v16  ;;  %473 = vst [vmem:[#allocation6 + $0x36c] sm:$0xff] %v472_v17   ;;  %v484_v20 = vld [vmem:[%s4708_s3 + $0x388] sm:$0xf]  ;;  %v488_v21 = vld [vmem:[%s4708_s3 + $0x38c] sm:$0xff]  }
  0x51   :  { %477 = vst [vmem:[#allocation6 + $0x374] sm:$0xf] %v476_v18  ;;  %481 = vst [vmem:[#allocation6 + $0x37c] sm:$0xff] %v480_v19   ;;  %v492_v22 = vld [vmem:[%s4708_s3 + $0x398] sm:$0xf]  ;;  %v496_v23 = vld [vmem:[%s4708_s3 + $0x39c] sm:$0xff]  }
  0x52   :  { %485 = vst [vmem:[#allocation6 + $0x384] sm:$0xf] %v484_v20  ;;  %489 = vst [vmem:[#allocation6 + $0x38c] sm:$0xff] %v488_v21   ;;  %v500_v24 = vld [vmem:[%s4708_s3 + $0x3a8] sm:$0xf]  ;;  %v504_v25 = vld [vmem:[%s4708_s3 + $0x3ac] sm:$0xff]  }
  0x53   :  { %493 = vst [vmem:[#allocation6 + $0x394] sm:$0xf] %v492_v22  ;;  %497 = vst [vmem:[#allocation6 + $0x39c] sm:$0xff] %v496_v23   ;;  %v508_v26 = vld [vmem:[%s4708_s3 + $0x3b8] sm:$0xf]  ;;  %v512_v27 = vld [vmem:[%s4708_s3 + $0x3bc] sm:$0xff]  }
  0x54   :  { %501 = vst [vmem:[#allocation6 + $0x3a4] sm:$0xf] %v500_v24  ;;  %505 = vst [vmem:[#allocation6 + $0x3ac] sm:$0xff] %v504_v25   ;;  %v516_v28 = vld [vmem:[%s4708_s3 + $0x3c8] sm:$0xf]  ;;  %v520_v29 = vld [vmem:[%s4708_s3 + $0x3cc] sm:$0xff]  }
  0x55   :  { %509 = vst [vmem:[#allocation6 + $0x3b4] sm:$0xf] %v508_v26  ;;  %513 = vst [vmem:[#allocation6 + $0x3bc] sm:$0xff] %v512_v27   ;;  %v524_v30 = vld [vmem:[%s4708_s3 + $0x3d8] sm:$0xf]  ;;  %v528_v31 = vld [vmem:[%s4708_s3 + $0x3dc] sm:$0xff]  }
  0x56   :  { %517 = vst [vmem:[#allocation6 + $0x3c4] sm:$0xf] %v516_v28  ;;  %521 = vst [vmem:[#allocation6 + $0x3cc] sm:$0xff] %v520_v29   ;;  %v532_v32 = vld [vmem:[%s4708_s3 + $0x3e8] sm:$0xf]  ;;  %v536_v33 = vld [vmem:[%s4708_s3 + $0x3ec] sm:$0xff]  }
  0x57   :  { %525 = vst [vmem:[#allocation6 + $0x3d4] sm:$0xf] %v524_v30  ;;  %529 = vst [vmem:[#allocation6 + $0x3dc] sm:$0xff] %v528_v31   ;;  %v540_v34 = vld [vmem:[%s4708_s3 + $0x3f8] sm:$0xf]  ;;  %v544_v35 = vld [vmem:[%s4708_s3 + $0x3fc] sm:$0xff]  }
  0x58   :  { %533 = vst [vmem:[#allocation6 + $0x3e4] sm:$0xf] %v532_v32  ;;  %537 = vst [vmem:[#allocation6 + $0x3ec] sm:$0xff] %v536_v33   ;;  %v548_v36 = vld [vmem:[%s4708_s3 + $0x408] sm:$0xf]  ;;  %v552_v37 = vld [vmem:[%s4708_s3 + $0x40c] sm:$0xff]  }
  0x59   :  { %541 = vst [vmem:[#allocation6 + $0x3f4] sm:$0xf] %v540_v34  ;;  %545 = vst [vmem:[#allocation6 + $0x3fc] sm:$0xff] %v544_v35   ;;  %v556_v38 = vld [vmem:[%s4708_s3 + $0x418] sm:$0xf]  ;;  %v560_v39 = vld [vmem:[%s4708_s3 + $0x41c] sm:$0xff]  }
  0x5a   :  { %549 = vst [vmem:[#allocation6 + $0x404] sm:$0xf] %v548_v36  ;;  %553 = vst [vmem:[#allocation6 + $0x40c] sm:$0xff] %v552_v37   ;;  %v564_v40 = vld [vmem:[%s4708_s3 + $0x428] sm:$0xf]  ;;  %v568_v41 = vld [vmem:[%s4708_s3 + $0x42c] sm:$0xff]  }
  0x5b   :  { %557 = vst [vmem:[#allocation6 + $0x414] sm:$0xf] %v556_v38  ;;  %561 = vst [vmem:[#allocation6 + $0x41c] sm:$0xff] %v560_v39   ;;  %v572_v42 = vld [vmem:[%s4708_s3 + $0x438] sm:$0xf]  ;;  %v576_v43 = vld [vmem:[%s4708_s3 + $0x43c] sm:$0xff]  }
  0x5c   :  { %565 = vst [vmem:[#allocation6 + $0x424] sm:$0xf] %v564_v40  ;;  %569 = vst [vmem:[#allocation6 + $0x42c] sm:$0xff] %v568_v41   ;;  %v580_v44 = vld [vmem:[%s4708_s3 + $0x448] sm:$0xf]  ;;  %v584_v45 = vld [vmem:[%s4708_s3 + $0x44c] sm:$0xff]  }
  0x5d   :  { %573 = vst [vmem:[#allocation6 + $0x434] sm:$0xf] %v572_v42  ;;  %577 = vst [vmem:[#allocation6 + $0x43c] sm:$0xff] %v576_v43   ;;  %v588_v46 = vld [vmem:[%s4708_s3 + $0x458] sm:$0xf]  ;;  %v592_v47 = vld [vmem:[%s4708_s3 + $0x45c] sm:$0xff]  }
  0x5e   :  { %581 = vst [vmem:[#allocation6 + $0x444] sm:$0xf] %v580_v44  ;;  %585 = vst [vmem:[#allocation6 + $0x44c] sm:$0xff] %v584_v45   ;;  %v596_v48 = vld [vmem:[%s4708_s3 + $0x468] sm:$0xf]  ;;  %v600_v49 = vld [vmem:[%s4708_s3 + $0x46c] sm:$0xff]  }
  0x5f   :  { %589 = vst [vmem:[#allocation6 + $0x454] sm:$0xf] %v588_v46  ;;  %593 = vst [vmem:[#allocation6 + $0x45c] sm:$0xff] %v592_v47   ;;  %v604_v50 = vld [vmem:[%s4708_s3 + $0x478] sm:$0xf]  ;;  %v608_v51 = vld [vmem:[%s4708_s3 + $0x47c] sm:$0xff]  }
  0x60   :  { %597 = vst [vmem:[#allocation6 + $0x464] sm:$0xf] %v596_v48  ;;  %601 = vst [vmem:[#allocation6 + $0x46c] sm:$0xff] %v600_v49   ;;  %v616_v52 = vld [vmem:[%s4708_s3 + $0x48c] sm:$0xff]   ;;  %v620_v53 = vld [vmem:[%s4708_s3 + $0x498] sm:$0xf] }
  0x61   :  { %605 = vst [vmem:[#allocation6 + $0x474] sm:$0xf] %v604_v50  ;;  %609 = vst [vmem:[#allocation6 + $0x47c] sm:$0xff] %v608_v51   ;;  %v624_v54 = vld [vmem:[%s4708_s3 + $0x49c] sm:$0xff]   ;;  %v628_v55 = vld [vmem:[%s4708_s3 + $0x4a8] sm:$0xf] }
  0x62   :  { %617 = vst [vmem:[#allocation6 + $0x48c] sm:$0xff] %v616_v52   ;;  %621 = vst [vmem:[#allocation6 + $0x494] sm:$0xf] %v620_v53  ;;  %v632_v56 = vld [vmem:[%s4708_s3 + $0x4ac] sm:$0xff]   ;;  %v636_v57 = vld [vmem:[%s4708_s3 + $0x4b8] sm:$0xf] }
  0x63   :  { %625 = vst [vmem:[#allocation6 + $0x49c] sm:$0xff] %v624_v54   ;;  %629 = vst [vmem:[#allocation6 + $0x4a4] sm:$0xf] %v628_v55  ;;  %v640_v58 = vld [vmem:[%s4708_s3 + $0x4bc] sm:$0xff]   ;;  %v644_v59 = vld [vmem:[%s4708_s3 + $0x4c8] sm:$0xf] }
  0x64   :  { %633 = vst [vmem:[#allocation6 + $0x4ac] sm:$0xff] %v632_v56   ;;  %637 = vst [vmem:[#allocation6 + $0x4b4] sm:$0xf] %v636_v57  ;;  %v648_v60 = vld [vmem:[%s4708_s3 + $0x4cc] sm:$0xff]   ;;  %v652_v61 = vld [vmem:[%s4708_s3 + $0x4d8] sm:$0xf] }
  0x65   :  { %641 = vst [vmem:[#allocation6 + $0x4bc] sm:$0xff] %v640_v58   ;;  %645 = vst [vmem:[#allocation6 + $0x4c4] sm:$0xf] %v644_v59  ;;  %v656_v62 = vld [vmem:[%s4708_s3 + $0x4dc] sm:$0xff]   ;;  %v3221_v1 = vld [vmem:[%s4705_s0 + $0x48] sm:$0xff]  ;;  %v3620_v3 = vmov 0.0  }
  0x66   :  { %649 = vst [vmem:[#allocation6 + $0x4cc] sm:$0xff] %v648_v60   ;;  %653 = vst [vmem:[#allocation6 + $0x4d4] sm:$0xf] %v652_v61  ;;  %v3220_v63 = vld [vmem:[%s4705_s0 + $0x40] sm:$0xff]  ;;  %v3217_v2 = vld [vmem:[%s4705_s0 + $0x28] sm:$0xff] }
  0x67   :  { %657 = vst [vmem:[#allocation6 + $0x4dc] sm:$0xff] %v656_v62   ;;  %v3216_v0 = vld [vmem:[%s4705_s0 + $0x20] sm:$0xff]  ;;  %1380 = vrot.lane.b32.xlu1 %v3220_v63, %s3618_s11  ;;  %1330 = vst.msk [vmem:[#allocation2] sm:$0xff] %vm1329_vm0, %v3620_v3 }
  0x68   :  { %1353 = vrot.lane.b32.xlu0 %v3216_v0, %s3619_s12  ;;  %1331 = vst.msk [vmem:[#allocation2 + $0x8] sm:$0xff] %vm1329_vm0, %v3620_v3  ;;  %1332 = vst.msk [vmem:[#allocation2 + $0x10] sm:$0xff] %vm1329_vm0, %v3620_v3 }
  0x69   :  { %1333 = vst.msk [vmem:[#allocation2 + $0x18] sm:$0xff] %vm1329_vm0, %v3620_v3 }
  0x6a   :  { %1328 = vsyncadd [#allocation7], 20224  ;;  %v3219_v4 = vld [vmem:[%s4705_s0 + $0x38] sm:$0xf]  ;;  %v3475_v5 = vld [vmem:[%s4707_s2 + $0x64] ss:$8 sps:$4 sm:$0xff]  }
  0x6b   :  { %v3477_v6 = vld [vmem:[%s4707_s2 + $0x60] ss:$8 sps:$4 sm:$0xff]   ;;  %1382 = vrot.lane.b32.xlu1 %v3221_v1, %s3618_s11  ;;  %v3478_v7 = vld [vmem:[%s4707_s2 + $0x74] ss:$8 sps:$4 sm:$0xff]   ;;  %vm1338_vm1 = vcmask 228352   ;;  %1500 = vmatprep.subr.bf16.mxu0 %v3475_v5  ;;  %v3621_v9 = vmov 0  }
  0x6c   :  { %1355 = vrot.lane.b32.xlu0 %v3217_v2, %s3619_s12  ;;  %v3218_v8 = vld [vmem:[%s4705_s0 + $0x30] sm:$0xff]  ;;  %1532 = vmatprep.mubr.bf16.mxu0 %v3621_v9  ;;  %v1334_v11 = vld [vmem:[%s4705_s0] sm:$0xff]  ;;  %v3223_v13 = vld [vmem:[%s4705_s0 + $0x58] sm:$0xf]  ;;  %vm1342_vm2 = vcmask 224256   ;;  %vm1493_vm3 = vcmask 1041408  }
  0x6d   :  { %1501 = vmatpush1.bf16.msra.mxu0 %v3477_v6  ;;  %v3480_v10 = vld [vmem:[%s4707_s2 + $0x70] ss:$8 sps:$4 sm:$0xff]   ;;  %v3481_v12 = vld [vmem:[%s4707_s2 + $0x84] ss:$8 sps:$4 sm:$0xff]   ;;  %1339 = vst.msk [vmem:[#allocation2 + $0x2] sm:$0xff] %vm1338_vm1, %v1334_v11  ;;  %vm1365_vm4 = vcmask 457952  }
  0x6e   :  { %1502 = vmatprep.subr.bf16.mxu0 %v3478_v7  ;;  %v1335_v14 = vld [vmem:[%s4705_s0 + $0x8] sm:$0xff]  ;;  %v3222_v15 = vld [vmem:[%s4705_s0 + $0x50] sm:$0xff]  ;;  %v1337_v17 = vld [vmem:[%s4705_s0 + $0x18] sm:$0xf]  ;;  %vm1392_vm5 = vcmask 687552   ;;  %vm1369_vm6 = vcmask 453856  }
  0x6f   :  { %1359 = vrot.lane.b32.xlu1 %v3219_v4, %s3619_s12  ;;  %1340 = vst.msk [vmem:[#allocation2 + $0xa] sm:$0xff] %vm1338_vm1, %v1335_v14  ;;  %v3483_v16 = vld [vmem:[%s4707_s2 + $0x80] ss:$8 sps:$4 sm:$0xff]   ;;  %v1336_v18 = vld [vmem:[%s4705_s0 + $0x10] sm:$0xff]  ;;  %v3487_v21 = vld [vmem:[%s4707_s2 + $0xa4] ss:$8 sps:$4 sm:$0xff]  }
  0x70   :  { %1357 = vrot.lane.b32.xlu0 %v3218_v8, %s3619_s12  ;;  %v3484_v19 = vld [vmem:[%s4707_s2 + $0x94] ss:$8 sps:$4 sm:$0xff]   ;;  %1343 = vst.msk [vmem:[#allocation2 + $0x1a] sm:$0xf] %vm1342_vm2, %v1337_v17  ;;  %v3486_v20 = vld [vmem:[%s4707_s2 + $0x90] ss:$8 sps:$4 sm:$0xff]  }
  0x71   :  { %1503 = vmatpush1.bf16.msra.mxu0 %v3480_v10  ;;  %1341 = vst.msk [vmem:[#allocation2 + $0x12] sm:$0xff] %vm1338_vm1, %v1336_v18  ;;  %v1431_v22 = vld [vmem:[%s4707_s2 + $0xb0] sm:$0x33]  ;;  %v3489_v23 = vld [vmem:[%s4707_s2 + $0xa0] ss:$8 sps:$4 sm:$0xff]   ;;  %vm1396_vm7 = vcmask 683456  }
  0x72   :  { %1504 = vmatprep.subr.bf16.mxu0 %v3481_v12  ;;  %v3235_v24 = vcombine.high %v1431_v22, %v1431_v22  ;;  %v3234_v25 = vcombine.low %v1431_v22, %v1431_v22  ;;  %v3494_v26 = vld [vmem:[%s4707_s2 + $0x4] ss:$8 sps:$4 sm:$0xff]   ;;  %v3562_v29 = vld [vmem:[%s4707_s2 + $0x1e0] ss:$8 sps:$4 sm:$0xff]   ;;  %v3563_v30 = vld [vmem:[%s4707_s2 + $0x1f4] ss:$8 sps:$4 sm:$0xff]  }
  0x73   :  { %1386 = vrot.lane.b32.xlu1 %v3223_v13, %s3618_s11  ;;  %v3560_v28 = vld [vmem:[%s4707_s2 + $0x1e4] ss:$8 sps:$4 sm:$0xff]   ;;  %v3565_v31 = vld [vmem:[%s4707_s2 + $0x1f0] ss:$8 sps:$4 sm:$0xff]   ;;  %v3568_v33 = vld [vmem:[%s4707_s2 + $0x200] ss:$8 sps:$4 sm:$0xff]  }
  0x74   :  { %1384 = vrot.lane.b32.xlu0 %v3222_v15, %s3618_s11  ;;  %v1495_v27 = vsel %vm1493_vm3, %v3234_v25, 0  ;;  %2280 = vmatprep.subr.bf16.mxu1 %v3560_v28  ;;  %v3566_v32 = vld [vmem:[%s4707_s2 + $0x204] ss:$8 sps:$4 sm:$0xff]   ;;  %v3569_v36 = vld [vmem:[%s4707_s2 + $0x214] ss:$8 sps:$4 sm:$0xff]   ;;  %vm2273_vm8 = vcmask 1043456  }
  0x75   :  { %1505 = vmatpush1.bf16.msra.mxu0 %v3483_v16  ;;  %2281 = vmatpush1.bf16.msra.mxu1 %v3562_v29  ;;  %v3571_v37 = vld [vmem:[%s4707_s2 + $0x210] ss:$8 sps:$4 sm:$0xff]   ;;  %v3572_v40 = vld [vmem:[%s4707_s2 + $0x224] ss:$8 sps:$4 sm:$0xff]   ;;  %v3574_v41 = vld [vmem:[%s4707_s2 + $0x220] ss:$8 sps:$4 sm:$0xff]  }
  0x76   :  { %1506 = vmatprep.subr.bf16.mxu0 %v3484_v19  ;;  %2282 = vmatprep.subr.bf16.mxu1 %v3563_v30  ;;  %v3575_v44 = vld [vmem:[%s4707_s2 + $0x234] ss:$8 sps:$4 sm:$0xff]   ;;  %v3577_v45 = vld [vmem:[%s4707_s2 + $0x230] ss:$8 sps:$4 sm:$0xff]   ;;  %v3578_v48 = vld [vmem:[%s4707_s2 + $0x244] ss:$8 sps:$4 sm:$0xff]  }
  0x77   :  { %v3492_v49 = vld [vmem:[%s4707_s2] ss:$8 sps:$4 sm:$0xff]   ;;  %v3497_v53 = vld [vmem:[%s4707_s2 + $0x14] ss:$8 sps:$4 sm:$0xff]   ;;  %v3495_v56 = vld [vmem:[%s4707_s2 + $0x10] ss:$8 sps:$4 sm:$0xff]  }
  0x78   :  { %v3580_v54 = vld [vmem:[%s4707_s2 + $0x240] ss:$8 sps:$4 sm:$0xff]   ;;  %v3581_v55 = vld [vmem:[%s4707_s2 + $0x254] ss:$8 sps:$4 sm:$0xff]   ;;  %v3500_v57 = vld [vmem:[%s4707_s2 + $0x24] ss:$8 sps:$4 sm:$0xff]  }
  0x79   :  { %1507 = vmatpush1.bf16.msra.mxu0 %v3486_v20  ;;  %2283 = vmatpush1.bf16.msra.mxu1 %v3565_v31  ;;  %v3583_v58 = vld [vmem:[%s4707_s2 + $0x250] ss:$8 sps:$4 sm:$0xff]   ;;  %v3584_v61 = vld [vmem:[%s4707_s2 + $0x264] ss:$8 sps:$4 sm:$0xff]   ;;  %v3498_v62 = vld [vmem:[%s4707_s2 + $0x20] ss:$8 sps:$4 sm:$0xff]  }
  0x7a   :  { %1508 = vmatprep.subr.bf16.mxu0 %v3487_v21  ;;  %2284 = vmatprep.subr.bf16.mxu1 %v3566_v32  ;;  %v3503_v0 = vld [vmem:[%s4707_s2 + $0x34] ss:$8 sps:$4 sm:$0xff]   ;;  %v3501_v1 = vld [vmem:[%s4707_s2 + $0x30] ss:$8 sps:$4 sm:$0xff]   ;;  %v3506_v2 = vld [vmem:[%s4707_s2 + $0x44] ss:$8 sps:$4 sm:$0xff]  }
  0x7b   :  { %v1414_v4 = vld [vmem:[%s4707_s2 + $0x50] sm:$0x33]  ;;  %v3504_v5 = vld [vmem:[%s4707_s2 + $0x40] ss:$8 sps:$4 sm:$0xff]   ;;  %v3511_v10 = vld [vmem:[%s4707_s2 + $0xc4] ss:$8 sps:$4 sm:$0xff]  }
  0x7c   :  { %v3250_v6 = vcombine.high %v1414_v4, %v1414_v4  ;;  %v3249_v7 = vcombine.low %v1414_v4, %v1414_v4  ;;  %v3509_v13 = vld [vmem:[%s4707_s2 + $0xc0] ss:$8 sps:$4 sm:$0xff]   ;;  %v3514_v15 = vld [vmem:[%s4707_s2 + $0xd4] ss:$8 sps:$4 sm:$0xff]   ;;  %v3512_v16 = vld [vmem:[%s4707_s2 + $0xd0] ss:$8 sps:$4 sm:$0xff]  }
  0x7d   :  { %1509 = vmatpush1.bf16.msra.mxu0 %v3489_v23  ;;  %2285 = vmatpush1.bf16.msra.mxu1 %v3568_v33  ;;  %v3517_v17 = vld [vmem:[%s4707_s2 + $0xe4] ss:$8 sps:$4 sm:$0xff]   ;;  %v3515_v20 = vld [vmem:[%s4707_s2 + $0xe0] ss:$8 sps:$4 sm:$0xff]   ;;  %v3520_v22 = vld [vmem:[%s4707_s2 + $0xf4] ss:$8 sps:$4 sm:$0xff]  }
  0x7e   :  { %3236 = vmatprep.subr.msk.bf16.mxu0 %vm1493_vm3, %v3235_v24  ;;  %2286 = vmatprep.subr.bf16.mxu1 %v3569_v36  ;;  %v1615_v8 = vsel %vm1493_vm3, %v3249_v7, 0  ;;  %v3518_v23 = vld [vmem:[%s4707_s2 + $0xf0] ss:$8 sps:$4 sm:$0xff]   ;;  %v3523_v24 = vld [vmem:[%s4707_s2 + $0x104] ss:$8 sps:$4 sm:$0xff]   ;;  %vm2266_vm9 = vcmask 326656  }
  0x7f   :  { %v1689_v25 = vld [vmem:[%s4707_s2 + $0x110] sm:$0x33]  ;;  %v3528_v30 = vld [vmem:[%s4707_s2 + $0x124] ss:$8 sps:$4 sm:$0xff]   ;;  %v3526_v33 = vld [vmem:[%s4707_s2 + $0x120] ss:$8 sps:$4 sm:$0xff]  }
  0x80   :  { %v3264_v28 = vcombine.low %v1689_v25, %v1689_v25  ;;  %v3529_v36 = vld [vmem:[%s4707_s2 + $0x130] ss:$8 sps:$4 sm:$0xff]   ;;  %vm2357_vm10 = vcmask 359424   ;;  %vm2373_vm11 = vcmask 683008  }
  0x81   :  { %1511 = vmatpush1.bf16.msra.mxu0 %v1495_v27  ;;  %2287 = vmatpush1.bf16.msra.mxu1 %v3571_v37  ;;  %v3265_v27 = vcombine.high %v1689_v25, %v1689_v25  ;;  %v3534_v37 = vld [vmem:[%s4707_s2 + $0x144] ss:$8 sps:$4 sm:$0xff]  }
  0x82   :  { %1620 = vmatprep.subr.bf16.mxu0 %v3494_v26  ;;  %2288 = vmatprep.subr.bf16.mxu1 %v3572_v40  ;;  %v3521_v26 = vld [vmem:[%s4707_s2 + $0x100] ss:$8 sps:$4 sm:$0xff]   ;;  %v1752_v29 = vsel %vm1493_vm3, %v3264_v28, 0 }
  0x83   :  { %v3532_v40 = vld [vmem:[%s4707_s2 + $0x140] ss:$8 sps:$4 sm:$0xff]  }
  0x85   :  { %2289 = vmatpush1.bf16.msra.mxu1 %v3574_v41 }
  0x86   :  { %2290 = vmatprep.subr.bf16.mxu1 %v3575_v44  ;;  %v3540_v44 = vld [vmem:[%s4707_s2 + $0x164] ss:$8 sps:$4 sm:$0xff]  }
  0x89   :  { %2291 = vmatpush1.bf16.msra.mxu1 %v3577_v45  ;;  %v1834_v45 = vld [vmem:[%s4707_s2 + $0x170] sm:$0x33] }
  0x8a   :  { %2292 = vmatprep.subr.bf16.mxu1 %v3578_v48  ;;  %v3279_v48 = vcombine.low %v1834_v45, %v1834_v45 }
  0x8d   :  { %2293 = vmatpush1.bf16.msra.mxu1 %v3580_v54 }
  0x8e   :  { %2294 = vmatprep.subr.bf16.mxu1 %v3581_v55  ;;  %v3548_v55 = vld [vmem:[%s4707_s2 + $0x194] ss:$8 sps:$4 sm:$0xff]  }
  0x91   :  { %2295 = vmatpush1.bf16.msra.mxu1 %v3583_v58 }
  0x92   :  { %2296 = vmatprep.subr.bf16.mxu1 %v3584_v61 }
  0xd9   :  { %v1381_v34 = vpop.permute.xlu1 %1380 }
  0xda   :  { %v1354_v35 = vpop.permute.xlu0 %1353 }
  0xdb   :  { %1366 = vst.msk [vmem:[#allocation2 + $0x2] sm:$0xff] %vm1365_vm4, %v1354_v35  ;;  %v3531_v35 = vld [vmem:[%s4707_s2 + $0x134] ss:$8 sps:$4 sm:$0xff]  }
  0xdc   :  { %1393 = vst.msk [vmem:[#allocation2 + $0x2] sm:$0xff] %vm1392_vm5, %v1381_v34 }
  0xdd   :  { %v1383_v38 = vpop.permute.xlu1 %1382 }
  0xde   :  { %v1356_v39 = vpop.permute.xlu0 %1355 }
  0xdf   :  { %1367 = vst.msk [vmem:[#allocation2 + $0xa] sm:$0xff] %vm1365_vm4, %v1356_v39 }
  0xe0   :  { %1394 = vst.msk [vmem:[#allocation2 + $0xa] sm:$0xff] %vm1392_vm5, %v1383_v38 }
  0xe1   :  { %v1360_v42 = vpop.permute.xlu1 %1359 }
  0xe2   :  { %v1358_v43 = vpop.permute.xlu0 %1357  ;;  %1370 = vst.msk [vmem:[#allocation2 + $0x1a] sm:$0xf] %vm1369_vm6, %v1360_v42  ;;  %v3537_v42 = vld [vmem:[%s4707_s2 + $0x154] ss:$8 sps:$4 sm:$0xff]  }
  0xe3   :  { %1368 = vst.msk [vmem:[#allocation2 + $0x12] sm:$0xff] %vm1365_vm4, %v1358_v43  ;;  %v1415_v50 = vld [vmem:[#allocation2 + $0x1] sm:$0xff]  ;;  %v3535_v43 = vld [vmem:[%s4707_s2 + $0x150] ss:$8 sps:$4 sm:$0xff]  }
  0xe4   :  { %v1398_v12 = vld [vmem:[#allocation2] sm:$0xff] }
  0xe5   :  { %v1387_v46 = vpop.permute.xlu1 %1386  ;;  %v1673_v32 = vld [vmem:[#allocation2 + $0x2] sm:$0xff] }
  0xe6   :  { %v1385_v47 = vpop.permute.xlu0 %1384  ;;  %1397 = vst.msk [vmem:[#allocation2 + $0x1a] sm:$0xf] %vm1396_vm7, %v1387_v46  ;;  %v3538_v46 = vld [vmem:[%s4707_s2 + $0x160] ss:$8 sps:$4 sm:$0xff]  }
  0xe7   :  { %1395 = vst.msk [vmem:[#allocation2 + $0x12] sm:$0xff] %vm1392_vm5, %v1385_v47  ;;  %v1416_v51 = vld [vmem:[#allocation2 + $0x9] sm:$0xff]  ;;  %v3280_v47 = vcombine.high %v1834_v45, %v1834_v45 }
  0xe8   :  { %v1419_v52 = vpack.c.bf16 %v1416_v51, %v1415_v50  ;;  %v1399_v11 = vld [vmem:[#allocation2 + $0x8] sm:$0xff] }
  0xe9   :  { %v1402_v14 = vpack.c.bf16 %v1399_v11, %v1398_v12  ;;  %v1674_v31 = vld [vmem:[#allocation2 + $0xa] sm:$0xff] }
  0xea   :  { %3237 = vmatmul.mubr.msk.bf16.vlgmr.msra.gmra.mrb[0].mxu0 %vm1329_vm0, %v1419_v52  ;;  %v1677_v34 = vpack.c.bf16 %v1674_v31, %v1673_v32  ;;  %v3545_v50 = vld [vmem:[%s4707_s2 + $0x184] ss:$8 sps:$4 sm:$0xff]  }
  0xeb   :  { %1621 = vmatpush1.bf16.msra.mxu0 %v3492_v49  ;;  %1542 = vmatprep.mubr.bf16.mxu0 %v3621_v9  ;;  %v1897_v49 = vsel %vm1493_vm3, %v3279_v48, 0  ;;  %v1818_v52 = vld [vmem:[#allocation2 + $0x3] sm:$0xff] }
  0xec   :  { %1622 = vmatprep.subr.bf16.mxu0 %v3497_v53  ;;  %v3543_v53 = vld [vmem:[%s4707_s2 + $0x180] ss:$8 sps:$4 sm:$0xff]  }
  0xed   :  { %v1676_v39 = vld [vmem:[#allocation2 + $0x1a] sm:$0xf] }
  0xee   :  { %v1417_v59 = vld [vmem:[#allocation2 + $0x11] sm:$0xff]  ;;  %v1418_v60 = vld [vmem:[#allocation2 + $0x19] sm:$0xf] }
  0xef   :  { %1623 = vmatpush1.bf16.msra.mxu0 %v3495_v56  ;;  %v1420_v63 = vpack.c.bf16 %v1418_v60, %v1417_v59  ;;  %v1400_v18 = vld [vmem:[#allocation2 + $0x10] sm:$0xff]  ;;  %v1401_v19 = vld [vmem:[#allocation2 + $0x18] sm:$0xf]  ;;  %v3549_v60 = vld [vmem:[%s4707_s2 + $0x1a0] ss:$8 sps:$4 sm:$0xff]  }
  0xf0   :  { %1624 = vmatprep.subr.bf16.mxu0 %v3500_v57  ;;  %v1403_v21 = vpack.c.bf16 %v1401_v19, %v1400_v18  ;;  %v1675_v38 = vld [vmem:[#allocation2 + $0x12] sm:$0xff]  ;;  %v3551_v57 = vld [vmem:[%s4707_s2 + $0x1a4] ss:$8 sps:$4 sm:$0xff]   ;;  %v1821_v59 = vld [vmem:[#allocation2 + $0x1b] sm:$0xf] }
  0xf1   :  { %v1678_v41 = vpack.c.bf16 %v1676_v39, %v1675_v38  ;;  %v1819_v51 = vld [vmem:[#allocation2 + $0xb] sm:$0xff]  ;;  %v1820_v58 = vld [vmem:[#allocation2 + $0x13] sm:$0xff]  ;;  %v1966_v12 = vld [vmem:[#allocation2 + $0x1c] sm:$0xf] }
  0xf2   :  { %3238 = vmatmul.mubr.msk.bf16.gmra.mrb[4].mxu0 %vm1329_vm0, %v1420_v63  ;;  %v1822_v54 = vpack.c.bf16 %v1819_v51, %v1818_v52  ;;  %v3546_v56 = vld [vmem:[%s4707_s2 + $0x190] ss:$8 sps:$4 sm:$0xff]   ;;  %v1823_v61 = vpack.c.bf16 %v1821_v59, %v1820_v58 }
  0xf3   :  { %1625 = vmatpush1.bf16.msra.mxu0 %v3498_v62  ;;  %1652 = vmatprep.mubr.bf16.mxu0 %v3621_v9  ;;  %v3554_v62 = vld [vmem:[%s4707_s2 + $0x1b4] ss:$8 sps:$4 sm:$0xff]   ;;  %v3552_v63 = vld [vmem:[%s4707_s2 + $0x1b0] ss:$8 sps:$4 sm:$0xff]  }
  0xf4   :  { %1626 = vmatprep.subr.bf16.mxu0 %v3503_v0  ;;  %v3557_v0 = vld [vmem:[%s4707_s2 + $0x1c4] ss:$8 sps:$4 sm:$0xff]   ;;  %v1965_v11 = vld [vmem:[#allocation2 + $0x14] sm:$0xff] }
  0xf5   :  { %v1964_v7 = vld [vmem:[#allocation2 + $0xc] sm:$0xff] }
  0xf7   :  { %1627 = vmatpush1.bf16.msra.mxu0 %v3501_v1  ;;  %v1979_v1 = vld [vmem:[%s4707_s2 + $0x1d0] sm:$0x33] }
  0xf8   :  { %1628 = vmatprep.subr.bf16.mxu0 %v3506_v2  ;;  %v3555_v2 = vld [vmem:[%s4707_s2 + $0x1c0] ss:$8 sps:$4 sm:$0xff]   ;;  %v3295_v4 = vcombine.high %v1979_v1, %v1979_v1 }
  0xfb   :  { %1629 = vmatpush1.bf16.msra.mxu0 %v3504_v5  ;;  %v3294_v5 = vcombine.low %v1979_v1, %v1979_v1 }
  0xfc   :  { %3251 = vmatprep.subr.msk.bf16.mxu0 %vm1493_vm3, %v3250_v6 }
  0xfd   :  { %v2042_v6 = vsel %vm1493_vm3, %v3294_v5, 0 }
  0xff   :  { %1631 = vmatpush1.bf16.msra.mxu0 %v1615_v8  ;;  %v1963_v8 = vld [vmem:[#allocation2 + $0x4] sm:$0xff] }
 0x100   :  { %1757 = vmatprep.subr.bf16.mxu0 %v3511_v10  ;;  %v1967_v10 = vpack.c.bf16 %v1964_v7, %v1963_v8 }
 0x102   :  { %3252 = vmatmul.mubr.msk.bf16.vlgmr.msra.gmra.mrb[0].mxu0 %vm1329_vm0, %v1402_v14  ;;  %v3586_v14 = vld [vmem:[%s4707_s2 + $0x260] ss:$8 sps:$4 sm:$0xff]  }
 0x103   :  { %1758 = vmatpush1.bf16.msra.mxu0 %v3509_v13  ;;  %1662 = vmatprep.mubr.bf16.mxu0 %v3621_v9  ;;  %v1968_v13 = vpack.c.bf16 %v1966_v12, %v1965_v11 }
 0x104   :  { %1759 = vmatprep.subr.bf16.mxu0 %v3514_v15  ;;  %2297 = vmatpush1.bf16.msra.mxu1 %v3586_v14  ;;  %v3587_v15 = vld [vmem:[%s4707_s2 + $0x274] ss:$8 sps:$4 sm:$0xff]  }
 0x105   :  { %2298 = vmatprep.subr.bf16.mxu1 %v3587_v15 }
 0x107   :  { %1760 = vmatpush1.bf16.msra.mxu0 %v3512_v16  ;;  %v3589_v16 = vld [vmem:[%s4707_s2 + $0x270] ss:$8 sps:$4 sm:$0xff]  }
 0x108   :  { %1761 = vmatprep.subr.bf16.mxu0 %v3517_v17  ;;  %2299 = vmatpush1.bf16.msra.mxu1 %v3589_v16  ;;  %v2160_v17 = vld [vmem:[%s4707_s2 + $0x280] sm:$0xff]  ;;  %s3622_s2 = smov 44  }
 0x109   :  { %v3320_v18 = vcombine.high %v2160_v17, %v2160_v17  ;;  %v3319_v19 = vcombine.low %v2160_v17, %v2160_v17 }
 0x10a   :  { %3253 = vmatmul.mubr.msk.bf16.gmra.mrb[4].mxu0 %vm1329_vm0, %v1403_v21  ;;  %v2110_v21 = vlaneseq }
 0x10b   :  { %1762 = vmatpush1.bf16.msra.mxu0 %v3515_v20  ;;  %1789 = vmatprep.mubr.bf16.mxu0 %v3621_v9  ;;  %v2275_v20 = vsel %vm2273_vm8, %v3319_v19, 0 }
 0x10c   :  { %1763 = vmatprep.subr.bf16.mxu0 %v3520_v22  ;;  %3321 = vmatprep.subr.msk.bf16.mxu1 %vm2273_vm8, %v3320_v18  ;;  %v4547_v22 = vshrl.u32 %v2110_v21, 7 }
 0x10d   :  { %2301 = vmatpush1.bf16.msra.mxu1 %v2275_v20 }
 0x10e   :  { %v4556_v25 = vsub.s32 1, %v4547_v22 }
 0x10f   :  { %1764 = vmatpush1.bf16.msra.mxu0 %v3518_v23  ;;  %v4550_v23 = vsub.s32 0, %v4547_v22 }
 0x110   :  { %1765 = vmatprep.subr.bf16.mxu0 %v3523_v24  ;;  %v2108_v24 = vld [vmem:[%s4706_s1] ss:$8 sm:$0x3] }
 0x113   :  { %1766 = vmatpush1.bf16.msra.mxu0 %v3521_v26  ;;  %v2113_v26 = vrot.slane %v2108_v24, %v4550_v23 }
 0x114   :  { %3266 = vmatprep.subr.msk.bf16.mxu0 %vm1493_vm3, %v3265_v27  ;;  %v2117_v27 = vrot.slane %v2108_v24, %v4556_v25 }
 0x117   :  { %1768 = vmatpush1.bf16.msra.mxu0 %v1752_v29 }
 0x118   :  { %1902 = vmatprep.subr.bf16.mxu0 %v3528_v30 }
 0x11a   :  { %3267 = vmatmul.mubr.msk.bf16.vlgmr.msra.gmra.mrb[0].mxu0 %vm1329_vm0, %v1677_v34 }
 0x11b   :  { %1903 = vmatpush1.bf16.msra.mxu0 %v3526_v33  ;;  %1799 = vmatprep.mubr.bf16.mxu0 %v3621_v9 }
 0x11c   :  { %1904 = vmatprep.subr.bf16.mxu0 %v3531_v35 }
 0x11f   :  { %1905 = vmatpush1.bf16.msra.mxu0 %v3529_v36 }
 0x120   :  { %1906 = vmatprep.subr.bf16.mxu0 %v3534_v37 }
 0x122   :  { %3268 = vmatmul.mubr.msk.bf16.gmra.mrb[4].mxu0 %vm1329_vm0, %v1678_v41 }
 0x123   :  { %1907 = vmatpush1.bf16.msra.mxu0 %v3532_v40  ;;  %1934 = vmatprep.mubr.bf16.mxu0 %v3621_v9 }
 0x124   :  { %1908 = vmatprep.subr.bf16.mxu0 %v3537_v42 }
 0x127   :  { %1909 = vmatpush1.bf16.msra.mxu0 %v3535_v43 }
 0x128   :  { %1910 = vmatprep.subr.bf16.mxu0 %v3540_v44 }
 0x12b   :  { %1911 = vmatpush1.bf16.msra.mxu0 %v3538_v46 }
 0x12c   :  { %3281 = vmatprep.subr.msk.bf16.mxu0 %vm1493_vm3, %v3280_v47 }
 0x12f   :  { %1913 = vmatpush1.bf16.msra.mxu0 %v1897_v49 }
 0x130   :  { %2047 = vmatprep.subr.bf16.mxu0 %v3545_v50 }
 0x132   :  { %3282 = vmatmul.mubr.msk.bf16.vlgmr.msra.gmra.mrb[0].mxu0 %vm1329_vm0, %v1822_v54 }
 0x133   :  { %2048 = vmatpush1.bf16.msra.mxu0 %v3543_v53  ;;  %1944 = vmatprep.mubr.bf16.mxu0 %v3621_v9 }
 0x134   :  { %2049 = vmatprep.subr.bf16.mxu0 %v3548_v55 }
 0x137   :  { %2050 = vmatpush1.bf16.msra.mxu0 %v3546_v56 }
 0x138   :  { %2051 = vmatprep.subr.bf16.mxu0 %v3551_v57 }
 0x13a   :  { %3283 = vmatmul.mubr.msk.bf16.gmra.mrb[4].mxu0 %vm1329_vm0, %v1823_v61 }
 0x13b   :  { %2052 = vmatpush1.bf16.msra.mxu0 %v3549_v60  ;;  %2079 = vmatprep.mubr.bf16.mxu0 %v3621_v9 }
 0x13c   :  { %2053 = vmatprep.subr.bf16.mxu0 %v3554_v62 }
 0x13f   :  { %2054 = vmatpush1.bf16.msra.mxu0 %v3552_v63 }
 0x140   :  { %2055 = vmatprep.subr.bf16.mxu0 %v3557_v0 }
 0x143   :  { %2056 = vmatpush1.bf16.msra.mxu0 %v3555_v2 }
 0x144   :  { %3296 = vmatprep.subr.msk.bf16.mxu0 %vm1493_vm3, %v3295_v4 }
 0x147   :  { %2058 = vmatpush1.bf16.msra.mxu0 %v2042_v6 }
 0x14a   :  { %3297 = vmatmul.mubr.msk.bf16.vlgmr.msra.gmra.mrb[0].mxu0 %vm1329_vm0, %v1967_v10 }
 0x14b   :  { %2089 = vmatprep.mubr.bf16.mxu0 %v3621_v9 }
 0x152   :  { %3298 = vmatmul.mubr.msk.bf16.gmra.mrb[4].mxu0 %vm1329_vm0, %v1968_v13 }
 0x21d   :  { %v2081_v28 = vpop.f32.mrb[0].mxu0 }
 0x21e   :  { %v2120_v29 = vadd.f32 %v2113_v26, %v2081_v28  ;;  %v2083_v30 = vpop.f32.mrb[1].mxu0 }
 0x21f   :  { %v2121_v31 = vadd.f32 %v2117_v27, %v2083_v30  ;;  %v2085_v32 = vpop.f32.mrb[2].mxu0 }
 0x220   :  { %v2122_v33 = vadd.f32 %v2113_v26, %v2085_v32  ;;  %v2087_v34 = vpop.f32.mrb[3].mxu0  ;;  %v2128_v36 = vmax.f32 %v2120_v29, 0.0 }
 0x221   :  { %v2123_v35 = vadd.f32 %v2117_v27, %v2087_v34  ;;  %v2129_v38 = vmax.f32 %v2121_v31, 0.0 }
 0x222   :  { %v2130_v37 = vmax.f32 %v2122_v33, 0.0 }
 0x223   :  { %v2131_v39 = vmax.f32 %v2123_v35, 0.0 }
 0x224   :  { %v2136_v40 = vpack.c.bf16 %v2130_v37, %v2128_v36 }
 0x225   :  { %v2091_v41 = vpop.f32.mrb[4].mxu0  ;;  %v2137_v42 = vpack.c.bf16 %v2131_v39, %v2129_v38 }
 0x226   :  { %v2124_v43 = vadd.f32 %v2113_v26, %v2091_v41  ;;  %v2093_v44 = vpop.f32.mrb[5].mxu0 }
 0x227   :  { %v2125_v45 = vadd.f32 %v2117_v27, %v2093_v44  ;;  %v2095_v46 = vpop.f32.mrb[6].mxu0  ;;  %3322 = vmatprep.mubr.msk.bf16.mxu1 %vm2266_vm9, %v2137_v42 }
 0x228   :  { %v2126_v47 = vadd.f32 %v2113_v26, %v2095_v46  ;;  %v2097_v48 = vpop.f32.mrb[7].mxu0  ;;  %2313 = vmatmul.mubr.bf16.vlgmr.msra.gmra.mrb[0].mxu1 %v2136_v40  ;;  %v2132_v50 = vmax.f32 %v2124_v43, 0.0 }
 0x229   :  { %v2127_v49 = vadd.f32 %v2117_v27, %v2097_v48  ;;  %v2133_v52 = vmax.f32 %v2125_v45, 0.0 }
 0x22a   :  { %v2134_v51 = vmax.f32 %v2126_v47, 0.0 }
 0x22b   :  { %v2135_v53 = vmax.f32 %v2127_v49, 0.0 }
 0x22c   :  { %v2138_v54 = vpack.c.bf16 %v2134_v51, %v2132_v50 }
 0x22d   :  { %v2139_v55 = vpack.c.bf16 %v2135_v53, %v2133_v52 }
 0x22f   :  { %3323 = vmatprep.mubr.msk.bf16.mxu1 %vm2266_vm9, %v2139_v55 }
 0x230   :  { %2323 = vmatmul.mubr.bf16.gmra.mrb[4].mxu1 %v2138_v54 }
 0x2fb   :  { %v2314_v56 = vpop.f32.mrb[0].mxu1 }
 0x2fc   :  { %2341 = vrot.lane.b32.xlu0 %v2314_v56, %s3622_s2  ;;  %v2316_v57 = vpop.f32.mrb[1].mxu1 }
 0x2fd   :  { %2343 = vrot.lane.b32.xlu1 %v2316_v57, %s3622_s2  ;;  %v2318_v58 = vpop.f32.mrb[2].mxu1 }
 0x2fe   :  { %v2320_v59 = vpop.f32.mrb[3].mxu1 }
 0x300   :  { %2345 = vrot.lane.b32.xlu0 %v2318_v58, %s3622_s2 }
 0x301   :  { %2347 = vrot.lane.b32.xlu1 %v2320_v59, %s3622_s2 }
 0x303   :  { %v2324_v60 = vpop.f32.mrb[4].mxu1 }
 0x304   :  { %2349 = vrot.lane.b32.xlu0 %v2324_v60, %s3622_s2  ;;  %v2326_v61 = vpop.f32.mrb[5].mxu1 }
 0x305   :  { %2351 = vrot.lane.b32.xlu1 %v2326_v61, %s3622_s2  ;;  %v2328_v62 = vpop.f32.mrb[6].mxu1 }
 0x306   :  { %v2330_v63 = vpop.f32.mrb[7].mxu1 }
 0x308   :  { %2353 = vrot.lane.b32.xlu0 %v2328_v62, %s3622_s2 }
 0x309   :  { %2355 = vrot.lane.b32.xlu1 %v2330_v63, %s3622_s2 }
 0x36e   :  { %v2342_v0 = vpop.permute.xlu0 %2341 }
 0x36f   :  { %v2344_v1 = vpop.permute.xlu1 %2343 }
 0x370   :  { %v2358_v2 = vsel %vm2357_vm10, %v2342_v0, %v2344_v1 }
 0x371   :  { %v2366_v4 = vmax.f32 %v2314_v56, %v2358_v2 }
 0x372   :  { %v2346_v5 = vpop.permute.xlu0 %2345 }
 0x373   :  { %2370 = vst.msk [vmem:[#allocation3] sm:$0xff] %vm1329_vm0, %v2366_v4  ;;  %v2348_v6 = vpop.permute.xlu1 %2347 }
 0x374   :  { %v2359_v7 = vsel %vm2357_vm10, %v2346_v5, %v2348_v6 }
 0x375   :  { %v2367_v8 = vmax.f32 %v2318_v58, %v2359_v7 }
 0x376   :  { %v2350_v10 = vpop.permute.xlu0 %2349 }
 0x377   :  { %2371 = vst.msk [vmem:[#allocation3 + $0x8] sm:$0xff] %vm1329_vm0, %v2367_v8  ;;  %v2352_v11 = vpop.permute.xlu1 %2351 }
 0x378   :  { %v2360_v12 = vsel %vm2357_vm10, %v2350_v10, %v2352_v11 }
 0x379   :  { %v2368_v13 = vmax.f32 %v2324_v60, %v2360_v12 }
 0x37a   :  { %v2354_v14 = vpop.permute.xlu0 %2353 }
 0x37b   :  { %2372 = vst.msk [vmem:[#allocation3 + $0x10] sm:$0xff] %vm1329_vm0, %v2368_v13  ;;  %v2356_v15 = vpop.permute.xlu1 %2355 }
 0x37c   :  { %v2361_v16 = vsel %vm2357_vm10, %v2354_v14, %v2356_v15 }
 0x37d   :  { %v2369_v17 = vmax.f32 %v2328_v62, %v2361_v16 }
 0x37e   :  { %v2375_v18 = vld [vmem:[#allocation3] ss:$2 sm:$0xff]  ;;  %v2379_v19 = vld [vmem:[#allocation3 + $0x1] ss:$2 sm:$0xff] }
 0x37f   :  { %v2382_v20 = vmax.f32 %v2375_v18, %v2379_v19  ;;  %2374 = vst.msk [vmem:[#allocation3 + $0x18] sm:$0xf] %vm2373_vm11, %v2369_v17 }
 0x386   :  { %v2377_v24 = vld [vmem:[#allocation3 + $0x10] ss:$2 sm:$0x3f]  ;;  %v2381_v26 = vld [vmem:[#allocation3 + $0x11] ss:$2 sm:$0x3f] }
 0x387   :  { %v2383_v27 = vmax.f32 %v2377_v24, %v2381_v26 }
 0x388   :  { %3614 = dma.done.wait [#allocation7], 20224 }
 0x389   :  { %3615 = vsyncadd [#allocation7], 4294947072  ;;  %2461 = vmatprep.mubr.bf16.mxu1 %v3621_v9  ;;  %v4570_v28 = vpack.c.bf16 %v2383_v27, %v2382_v20  ;;  %v2402_v34 = vld [vmem:[#allocation6 + $0x68] sm:$0xff]  ;;  %v2401_v35 = vld [vmem:[#allocation6 + $0x60] sm:$0xff]  ;;  %vm2776_vm12 = vcmask 261120   ;;  %s3623_s22 = smov 48  }
 0x38a   :  { %v2404_v36 = vld [vmem:[#allocation6 + $0x78] sm:$0xff]  ;;  %2429 = vmatprep.subr.bf16.mxu1 %v2402_v34  ;;  %v2403_v37 = vld [vmem:[#allocation6 + $0x70] sm:$0xff]  ;;  %v2406_v38 = vld [vmem:[#allocation6 + $0x88] sm:$0xff]  ;;  %vm2835_vm13 = vcmask 392192   ;;  %vm2842_vm14 = vcmask 654336   ;;  %vm2844_vm15 = vcmask 648192  }
 0x38b   :  { %v2414_v29 = vshrl.u32 %v4570_v28, 16  ;;  %v2416_v30 = vshll.u32 %v4570_v28, 16  ;;  %2430 = vmatpush1.bf16.msra.mxu1 %v2401_v35  ;;  %v2405_v39 = vld [vmem:[#allocation6 + $0x80] sm:$0xff]  ;;  %v2408_v40 = vld [vmem:[#allocation6 + $0x98] sm:$0xff]  ;;  %v2407_v41 = vld [vmem:[#allocation6 + $0x90] sm:$0xff]  ;;  %vm2852_vm1 = vcmp.lt.s32.totalorder %v2110_v21, 80 }
 0x38c   :  { %2431 = vmatprep.subr.bf16.mxu1 %v2404_v36  ;;  %v2410_v42 = vld [vmem:[#allocation6 + $0xa8] sm:$0xff]  ;;  %v2409_v43 = vld [vmem:[#allocation6 + $0xa0] sm:$0xff]  ;;  %v2412_v44 = vld [vmem:[#allocation6 + $0xb8] sm:$0x3]  ;;  %s3625_s0 = smov 80   ;;  %s3626_s23 = smov 112  }
 0x38d   :  { %v4574_v31 = vrot.slane %v2414_v29, 1  ;;  %v4576_v32 = vrot.slane %v2416_v30, 2  ;;  %v2411_v45 = vld [vmem:[#allocation6 + $0xb0] sm:$0x3]  ;;  %v2418_v46 = vrot.slane %v2416_v30, 1  ;;  %v2390_v48 = vld [vmem:[#allocation6 + $0x8] sm:$0xff] }
 0x38e   :  { %v2424_v47 = vsel %vm1493_vm3, %v2411_v45, 0  ;;  %v2757_v49 = vld [vmem:[#allocation6 + $0x1e8] sm:$0xff]  ;;  %v2756_v50 = vld [vmem:[#allocation6 + $0x1e0] sm:$0xff]  ;;  %v2759_v51 = vld [vmem:[#allocation6 + $0x1f8] sm:$0xff]  ;;  %s3627_s24 = smov 64   ;;  %s3628_s25 = smov 32  }
 0x38f   :  { %v2607_v33 = vor.u32 %v4576_v32, %v4574_v31  ;;  %2432 = vmatpush1.bf16.msra.mxu1 %v2403_v37  ;;  %v2419_v52 = vor.u32 %v2418_v46, %v2414_v29  ;;  %2780 = vmatprep.subr.bf16.mxu0 %v2757_v49  ;;  %v2389_v53 = vld [vmem:[#allocation6] sm:$0xff]  ;;  %v2392_v54 = vld [vmem:[#allocation6 + $0x18] sm:$0xff]  ;;  %v2758_v55 = vld [vmem:[#allocation6 + $0x1f0] sm:$0xff]  ;;  %v2536_v37 = vrot.slane %v4570_v28, 1  ;;  %vm2883_vm2 = vcmp.ge.s32.totalorder %v2110_v21, 80  ;;  %s3630_s5 = smov [#allocation8]  }
 0x390   :  { %2433 = vmatprep.subr.bf16.mxu1 %v2406_v38  ;;  %2781 = vmatpush1.bf16.msra.mxu0 %v2756_v50  ;;  %v2761_v56 = vld [vmem:[#allocation6 + $0x208] sm:$0xff]  ;;  %v2391_v57 = vld [vmem:[#allocation6 + $0x10] sm:$0xff]  ;;  %v2760_v59 = vld [vmem:[#allocation6 + $0x200] sm:$0xff]  ;;  %vm2884_vm4 = vcmp.lt.s32.totalorder %v2110_v21, 160  ;;  %vm4627_vm6 = vcmp.ge.s32.totalorder %v2110_v21, 32  ;;  %vm4632_vm7 = vcmp.lt.s32.totalorder %v2110_v21, 112 }
 0x391   :  { %2782 = vmatprep.subr.bf16.mxu0 %v2759_v51  ;;  %v2394_v58 = vld [vmem:[#allocation6 + $0x28] sm:$0xff]  ;;  %v2763_v60 = vld [vmem:[#allocation6 + $0x218] sm:$0xff]  ;;  %v2393_v61 = vld [vmem:[#allocation6 + $0x20] sm:$0xff]  ;;  %vm4637_vm9 = vcmp.ge.s32.totalorder %v2110_v21, 112  ;;  %vm4642_vm10 = vcmp.lt.s32.totalorder %v2110_v21, 192  ;;  %vm4648_vm11 = vcmp.ge.s32.totalorder %v2110_v21, 64 }
 0x392   :  { %v2396_v62 = vld [vmem:[#allocation6 + $0x38] sm:$0xff]  ;;  %v2762_v63 = vld [vmem:[#allocation6 + $0x210] sm:$0xff]  ;;  %v2765_v0 = vld [vmem:[#allocation6 + $0x228] sm:$0xff]  ;;  %s3188_s6 = sshll.u32 %s3630_s5, 4  ;;  %s3189_s6 = int_to_ptr.vmem [resolvable:$true] %s3188_s6 }
 0x393   :  { %2434 = vmatpush1.bf16.msra.mxu1 %v2405_v39  ;;  %v2395_v1 = vld [vmem:[#allocation6 + $0x30] sm:$0xff]  ;;  %v2398_v2 = vld [vmem:[#allocation6 + $0x48] sm:$0xff]  ;;  %v2764_v4 = vld [vmem:[#allocation6 + $0x220] sm:$0xff]  ;;  %s3592_s7 = scalar_lea.vmem %s3189_s6, 16  ;;  %s3596_s8 = scalar_lea.vmem %s3189_s6, 32 }
 0x394   :  { %2435 = vmatprep.subr.bf16.mxu1 %v2408_v40  ;;  %2783 = vmatpush1.bf16.msra.mxu0 %v2758_v55  ;;  %v2767_v5 = vld [vmem:[#allocation6 + $0x238] sm:$0xff]  ;;  %v2397_v6 = vld [vmem:[#allocation6 + $0x40] sm:$0xff]  ;;  %v2399_v8 = vld [vmem:[#allocation6 + $0x50] sm:$0x3]  ;;  %p3593_p0 = scmp.ne.s32.totalorder %s3189_s6, %s3592_s7  ;;  %p3597_p1 = scmp.lt.s32.totalorder %s3189_s6, %s3189_s6 }
 0x395   :  { %2784 = vmatprep.subr.bf16.mxu0 %v2761_v56  ;;  %v2400_v7 = vld [vmem:[#allocation6 + $0x58] sm:$0x3]  ;;  %v2766_v10 = vld [vmem:[#allocation6 + $0x230] sm:$0xff]  ;;  %v2769_v11 = vld [vmem:[#allocation6 + $0x248] sm:$0xff]  ;;  %v2475_v12 = vsel %vm1493_vm3, %v2399_v8, 0  ;;  %p3598_p2 = scmp.lt.s32.totalorder %s3596_s8, %s3592_s7 }
 0x396   :  { %v2524_v13 = vld [vmem:[#allocation6 + $0xc8] sm:$0xff]  ;;  %v2768_v14 = vld [vmem:[#allocation6 + $0x240] sm:$0xff]  ;;  %v2771_v15 = vld [vmem:[#allocation6 + $0x258] sm:$0xff] }
 0x397   :  { %2436 = vmatpush1.bf16.msra.mxu1 %v2407_v41  ;;  %v2523_v16 = vld [vmem:[#allocation6 + $0xc0] sm:$0xff]  ;;  %v2526_v17 = vld [vmem:[#allocation6 + $0xd8] sm:$0xff]  ;;  %v2525_v18 = vld [vmem:[#allocation6 + $0xd0] sm:$0xff]  ;;  %p3599_p3 = por %p3598_p2, %p3597_p1 }
 0x398   :  { %2437 = vmatprep.subr.bf16.mxu1 %v2410_v42  ;;  %2785 = vmatpush1.bf16.msra.mxu0 %v2760_v59  ;;  %v2528_v19 = vld [vmem:[#allocation6 + $0xe8] sm:$0xff]  ;;  %v2527_v20 = vld [vmem:[#allocation6 + $0xe0] sm:$0xff]  ;;  %v2530_v24 = vld [vmem:[#allocation6 + $0xf8] sm:$0xff] }
 0x399   :  { %2786 = vmatprep.subr.bf16.mxu0 %v2763_v60  ;;  %v2529_v26 = vld [vmem:[#allocation6 + $0xf0] sm:$0xff]  ;;  %v2532_v27 = vld [vmem:[#allocation6 + $0x108] sm:$0xff]  ;;  %v2531_v29 = vld [vmem:[#allocation6 + $0x100] sm:$0xff]  ;;  %v2676_v60 = vrot.slane %v4570_v28, 2  ;;  %p3600_p4 = pnand %p3599_p3, %p3593_p0 }
 0x39a   :  { %v2534_v30 = vld [vmem:[#allocation6 + $0x118] sm:$0x3]  ;;  %v2533_v34 = vld [vmem:[#allocation6 + $0x110] sm:$0x3]  ;;  %v2594_v36 = vld [vmem:[#allocation6 + $0x128] sm:$0xff] }
 0x39b   :  { %2438 = vmatpush1.bf16.msra.mxu1 %v2409_v43  ;;  %v2541_v35 = vsel %vm1493_vm3, %v2533_v34, 0  ;;  %v2593_v38 = vld [vmem:[#allocation6 + $0x120] sm:$0xff]  ;;  %v2596_v39 = vld [vmem:[#allocation6 + $0x138] sm:$0xff]  ;;  %v2595_v40 = vld [vmem:[#allocation6 + $0x130] sm:$0xff] }
 0x39c   :  { %3324 = vmatprep.subr.msk.bf16.mxu1 %vm1493_vm3, %v2412_v44  ;;  %2787 = vmatpush1.bf16.msra.mxu0 %v2762_v63  ;;  %v2598_v41 = vld [vmem:[#allocation6 + $0x148] sm:$0xff]  ;;  %v2597_v42 = vld [vmem:[#allocation6 + $0x140] sm:$0xff]  ;;  %v2600_v43 = vld [vmem:[#allocation6 + $0x158] sm:$0xff] }
 0x39d   :  { %2788 = vmatprep.subr.bf16.mxu0 %v2765_v0  ;;  %v2599_v44 = vld [vmem:[#allocation6 + $0x150] sm:$0xff]  ;;  %v2602_v45 = vld [vmem:[#allocation6 + $0x168] sm:$0xff]  ;;  %v2601_v46 = vld [vmem:[#allocation6 + $0x160] sm:$0xff] }
 0x39e   :  { %v2665_v50 = vld [vmem:[#allocation6 + $0x188] sm:$0xff]  ;;  %v2664_v51 = vld [vmem:[#allocation6 + $0x180] sm:$0xff]  ;;  %v2671_v56 = vld [vmem:[#allocation6 + $0x1b8] sm:$0xff] }
 0x39f   :  { %2440 = vmatpush1.bf16.msra.mxu1 %v2424_v47  ;;  %v2604_v47 = vld [vmem:[#allocation6 + $0x178] sm:$0x3]  ;;  %v2668_v55 = vld [vmem:[#allocation6 + $0x1a0] sm:$0xff]  ;;  %v2674_v32 = vld [vmem:[#allocation6 + $0x1d0] sm:$0x3] }
 0x3a0   :  { %2480 = vmatprep.subr.bf16.mxu1 %v2390_v48  ;;  %2789 = vmatpush1.bf16.msra.mxu0 %v2764_v4  ;;  %v2603_v48 = vld [vmem:[#allocation6 + $0x170] sm:$0x3]  ;;  %v2672_v59 = vld [vmem:[#allocation6 + $0x1c0] sm:$0xff]  ;;  %v2675_v31 = vld [vmem:[#allocation6 + $0x1d8] sm:$0x3] }
 0x3a1   :  { %2790 = vmatprep.subr.bf16.mxu0 %v2767_v5  ;;  %v2612_v49 = vsel %vm1493_vm3, %v2603_v48, 0  ;;  %v2772_v63 = vld [vmem:[#allocation6 + $0x260] sm:$0xff]  ;;  %v2775_v0 = vld [vmem:[#allocation6 + $0x278] sm:$0xff]  ;;  %vm2885_vm5 = vmand %vm2883_vm2, %vm2884_vm4  ;;  %vm2983_vm4 = vcmask 130048  }
 0x3a2   :  { %3325 = vmatmul.mubr.msk.bf16.vlgmr.msra.gmra.mrb[8].mxu1 %vm1329_vm0, %v2419_v52  ;;  %v2667_v52 = vld [vmem:[#allocation6 + $0x198] sm:$0xff]  ;;  %v2957_v34 = vld [vmem:[#allocation6 + $0x280] sm:$0xff] }
 0x3a3   :  { %2481 = vmatpush1.bf16.msra.mxu1 %v2389_v53  ;;  %2512 = vmatprep.mubr.bf16.mxu1 %v3621_v9  ;;  %v2666_v53 = vld [vmem:[#allocation6 + $0x190] sm:$0xff] }
 0x3a4   :  { %2482 = vmatprep.subr.bf16.mxu1 %v2392_v54  ;;  %2791 = vmatpush1.bf16.msra.mxu0 %v2766_v10  ;;  %v2669_v54 = vld [vmem:[#allocation6 + $0x1a8] sm:$0xff] }
 0x3a5   :  { %2792 = vmatprep.subr.bf16.mxu0 %v2769_v11 }
 0x3a7   :  { %2483 = vmatpush1.bf16.msra.mxu1 %v2391_v57  ;;  %v2670_v57 = vld [vmem:[#allocation6 + $0x1b0] sm:$0xff] }
 0x3a8   :  { %2484 = vmatprep.subr.bf16.mxu1 %v2394_v58  ;;  %2793 = vmatpush1.bf16.msra.mxu0 %v2768_v14  ;;  %v2673_v58 = vld [vmem:[#allocation6 + $0x1c8] sm:$0xff] }
 0x3a9   :  { %2794 = vmatprep.subr.bf16.mxu0 %v2771_v15 }
 0x3ab   :  { %2485 = vmatpush1.bf16.msra.mxu1 %v2393_v61  ;;  %v2770_v61 = vld [vmem:[#allocation6 + $0x250] sm:$0xff] }
 0x3ac   :  { %2486 = vmatprep.subr.bf16.mxu1 %v2396_v62  ;;  %2795 = vmatpush1.bf16.msra.mxu0 %v2770_v61  ;;  %v2773_v62 = vld [vmem:[#allocation6 + $0x268] sm:$0xff] }
 0x3ad   :  { %2796 = vmatprep.subr.bf16.mxu0 %v2773_v62  ;;  %v2970_v62 = vld [vmem:[#allocation6 + $0x350] sm:$0xff] }
 0x3af   :  { %2487 = vmatpush1.bf16.msra.mxu1 %v2395_v1  ;;  %v2774_v1 = vld [vmem:[#allocation6 + $0x270] sm:$0xff] }
 0x3b0   :  { %2488 = vmatprep.subr.bf16.mxu1 %v2398_v2  ;;  %2797 = vmatpush1.bf16.msra.mxu0 %v2772_v63  ;;  %v3334_v2 = vld [vmem:[%s4706_s1 + $0x1] ss:$8 sm:$0x3] }
 0x3b1   :  { %2798 = vmatprep.subr.bf16.mxu0 %v2775_v0  ;;  %v2743_v4 = vrot.slane %v3334_v2, %v4556_v25  ;;  %v2962_v63 = vld [vmem:[#allocation6 + $0x2d0] sm:$0xff] }
 0x3b3   :  { %2489 = vmatpush1.bf16.msra.mxu1 %v2397_v6 }
 0x3b4   :  { %3326 = vmatprep.subr.msk.bf16.mxu1 %vm1493_vm3, %v2400_v7  ;;  %2799 = vmatpush1.bf16.msra.mxu0 %v2774_v1  ;;  %v2979_v1 = vld [vmem:[#allocation6 + $0x3e0] sm:$0xff] }
 0x3b7   :  { %2491 = vmatpush1.bf16.msra.mxu1 %v2475_v12 }
 0x3b8   :  { %2546 = vmatprep.subr.bf16.mxu1 %v2524_v13 }
 0x3ba   :  { %3327 = vmatmul.mubr.msk.bf16.vlgmr.msra.gmra.mrb[8].mxu1 %vm1329_vm0, %v4570_v28  ;;  %v2739_v28 = vrot.slane %v3334_v2, %v4550_v23  ;;  %v2971_v2 = vld [vmem:[#allocation6 + $0x360] sm:$0xff] }
 0x3bb   :  { %2547 = vmatpush1.bf16.msra.mxu1 %v2523_v16  ;;  %2578 = vmatprep.mubr.bf16.mxu1 %v3621_v9 }
 0x3bc   :  { %2548 = vmatprep.subr.bf16.mxu1 %v2526_v17 }
 0x3bf   :  { %2549 = vmatpush1.bf16.msra.mxu1 %v2525_v18 }
 0x3c0   :  { %2550 = vmatprep.subr.bf16.mxu1 %v2528_v19 }
 0x3c3   :  { %2551 = vmatpush1.bf16.msra.mxu1 %v2527_v20 }
 0x3c4   :  { %2552 = vmatprep.subr.bf16.mxu1 %v2530_v24 }
 0x3c7   :  { %2553 = vmatpush1.bf16.msra.mxu1 %v2529_v26 }
 0x3c8   :  { %2554 = vmatprep.subr.bf16.mxu1 %v2532_v27 }
 0x3cb   :  { %2555 = vmatpush1.bf16.msra.mxu1 %v2531_v29  ;;  %v2973_v29 = vld [vmem:[#allocation6 + $0x380] sm:$0xff] }
 0x3cc   :  { %3328 = vmatprep.subr.msk.bf16.mxu1 %vm1493_vm3, %v2534_v30  ;;  %v2965_v30 = vld [vmem:[#allocation6 + $0x300] sm:$0xff] }
 0x3cd   :  { %3340 = vmatprep.subr.bf16.mxu0 %v2965_v30 }
 0x3cf   :  { %2557 = vmatpush1.bf16.msra.mxu1 %v2541_v35  ;;  %v2966_v35 = vld [vmem:[#allocation6 + $0x310] sm:$0xff] }
 0x3d0   :  { %2617 = vmatprep.subr.bf16.mxu1 %v2594_v36  ;;  %v2974_v36 = vld [vmem:[#allocation6 + $0x390] sm:$0xff] }
 0x3d2   :  { %3329 = vmatmul.mubr.msk.bf16.vlgmr.msra.gmra.mrb[8].mxu1 %vm1329_vm0, %v2536_v37  ;;  %v2958_v37 = vld [vmem:[#allocation6 + $0x290] sm:$0xff] }
 0x3d3   :  { %2618 = vmatpush1.bf16.msra.mxu1 %v2593_v38  ;;  %2649 = vmatprep.mubr.bf16.mxu1 %v3621_v9  ;;  %v2967_v38 = vld [vmem:[#allocation6 + $0x320] sm:$0xff] }
 0x3d4   :  { %2619 = vmatprep.subr.bf16.mxu1 %v2596_v39  ;;  %v2975_v39 = vld [vmem:[#allocation6 + $0x3a0] sm:$0xff] }
 0x3d7   :  { %2620 = vmatpush1.bf16.msra.mxu1 %v2595_v40  ;;  %v2959_v40 = vld [vmem:[#allocation6 + $0x2a0] sm:$0xff] }
 0x3d8   :  { %2621 = vmatprep.subr.bf16.mxu1 %v2598_v41  ;;  %v2976_v41 = vld [vmem:[#allocation6 + $0x3b0] sm:$0xff] }
 0x3db   :  { %2622 = vmatpush1.bf16.msra.mxu1 %v2597_v42 }
 0x3dc   :  { %2623 = vmatprep.subr.bf16.mxu1 %v2600_v43 }
 0x3df   :  { %2624 = vmatpush1.bf16.msra.mxu1 %v2599_v44 }
 0x3e0   :  { %2625 = vmatprep.subr.bf16.mxu1 %v2602_v45 }
 0x3e3   :  { %2626 = vmatpush1.bf16.msra.mxu1 %v2601_v46 }
 0x3e4   :  { %3330 = vmatprep.subr.msk.bf16.mxu1 %vm1493_vm3, %v2604_v47 }
 0x3e7   :  { %2628 = vmatpush1.bf16.msra.mxu1 %v2612_v49 }
 0x3e8   :  { %2686 = vmatprep.subr.bf16.mxu1 %v2665_v50  ;;  %v3624_v50 = vmov 1966171168  }
 0x3ea   :  { %3331 = vmatmul.mubr.msk.bf16.vlgmr.msra.gmra.mrb[8].mxu1 %vm1329_vm0, %v2607_v33  ;;  %v2681_v33 = vsel %vm1493_vm3, %v2674_v32, 0  ;;  %v2961_v32 = vld [vmem:[#allocation6 + $0x2c0] sm:$0xff] }
 0x3eb   :  { %2687 = vmatpush1.bf16.msra.mxu1 %v2664_v51  ;;  %2718 = vmatprep.mubr.bf16.mxu1 %v3621_v9  ;;  %v2857_v51 = vunpack.c.l.s4 %v3624_v50  ;;  %v3075_v50 = vld [vmem:[#allocation6 + $0x470] sm:$0xff] }
 0x3ec   :  { %2688 = vmatprep.subr.bf16.mxu1 %v2667_v52 }
 0x3ed   :  { %v2858_v52 = vunpack.c.0.s8 %v2857_v51  ;;  %v3076_v51 = vld [vmem:[#allocation6 + $0x480] sm:$0xf] }
 0x3ef   :  { %2689 = vmatpush1.bf16.msra.mxu1 %v2666_v53  ;;  %v2968_v53 = vld [vmem:[#allocation6 + $0x330] sm:$0xff] }
 0x3f0   :  { %2690 = vmatprep.subr.bf16.mxu1 %v2669_v54  ;;  %v2960_v54 = vld [vmem:[#allocation6 + $0x2b0] sm:$0xff] }
 0x3f3   :  { %2691 = vmatpush1.bf16.msra.mxu1 %v2668_v55  ;;  %v2977_v55 = vld [vmem:[#allocation6 + $0x3c0] sm:$0xff] }
 0x3f4   :  { %2692 = vmatprep.subr.bf16.mxu1 %v2671_v56  ;;  %v2861_v56 = vsub.s32 %v2858_v52, %v4547_v22  ;;  %v3083_v52 = vsel %vm2273_vm8, %v3076_v51, 0  ;;  %vm3078_vm8 = vcmask 982016  }
 0x3f7   :  { %2693 = vmatpush1.bf16.msra.mxu1 %v2670_v57 }
 0x3f8   :  { %2694 = vmatprep.subr.bf16.mxu1 %v2673_v58 }
 0x3fb   :  { %2695 = vmatpush1.bf16.msra.mxu1 %v2672_v59 }
 0x3fc   :  { %3332 = vmatprep.subr.msk.bf16.mxu1 %vm1493_vm3, %v2675_v31  ;;  %v2969_v31 = vld [vmem:[#allocation6 + $0x340] sm:$0xff] }
 0x3ff   :  { %2697 = vmatpush1.bf16.msra.mxu1 %v2681_v33  ;;  %v2978_v33 = vld [vmem:[#allocation6 + $0x3d0] sm:$0xff] }
 0x400   :  { %3027 = vmatprep.subr.bf16.mxu1 %v3621_v9 }
 0x402   :  { %3333 = vmatmul.mubr.msk.bf16.vlgmr.msra.gmra.mrb[8].mxu1 %vm1329_vm0, %v2676_v60 }
 0x403   :  { %3028 = vmatpush1.bf16.msra.mxu1 %v2973_v29 }
 0x404   :  { %3029 = vmatprep.subr.bf16.mxu1 %v3621_v9 }
 0x407   :  { %3030 = vmatpush1.bf16.msra.mxu1 %v2974_v36  ;;  %v2947_v36 = vsub.s32 3, %v4547_v22 }
 0x408   :  { %3031 = vmatprep.subr.bf16.mxu1 %v3621_v9 }
 0x40b   :  { %3032 = vmatpush1.bf16.msra.mxu1 %v2975_v39 }
 0x40c   :  { %3033 = vmatprep.subr.bf16.mxu1 %v3621_v9 }
 0x40f   :  { %3034 = vmatpush1.bf16.msra.mxu1 %v2976_v41 }
 0x410   :  { %3035 = vmatprep.subr.bf16.mxu1 %v3621_v9 }
 0x413   :  { %3036 = vmatpush1.bf16.msra.mxu1 %v2977_v55  ;;  %v3129_v55 = vld [vmem:[#allocation6 + $0x4b0] sm:$0xff] }
 0x414   :  { %3037 = vmatprep.subr.bf16.mxu1 %v3621_v9 }
 0x417   :  { %3038 = vmatpush1.bf16.msra.mxu1 %v2978_v33 }
 0x418   :  { %3039 = vmatprep.subr.bf16.mxu1 %v3621_v9 }
 0x41b   :  { %3040 = vmatpush1.bf16.msra.mxu1 %v2979_v1 }
 0x41c   :  { %3041 = vmatprep.subr.bf16.mxu1 %v3621_v9 }
 0x4d5   :  { %v2720_v5 = vpop.f32.mrb[8].mxu1 }
 0x4d6   :  { %v2746_v6 = vadd.f32 %v2739_v28, %v2720_v5  ;;  %v2722_v7 = vpop.f32.mrb[9].mxu1  ;;  %v2980_v5 = vld [vmem:[#allocation6 + $0x3f0] sm:$0xff] }
 0x4d7   :  { %v2747_v8 = vadd.f32 %v2743_v4, %v2722_v7  ;;  %v2724_v10 = vpop.f32.mrb[10].mxu1  ;;  %3042 = vmatpush1.bf16.msra.mxu1 %v2980_v5  ;;  %v3132_v5 = vld [vmem:[#allocation6 + $0x4e0] sm:$0x3] }
 0x4d8   :  { %v2748_v11 = vadd.f32 %v2739_v28, %v2724_v10  ;;  %v2726_v12 = vpop.f32.mrb[11].mxu1  ;;  %v2750_v14 = vmax.f32 %v2746_v6, 0.0  ;;  %v2963_v6 = vld [vmem:[#allocation6 + $0x2e0] sm:$0xff]  ;;  %v2972_v10 = vld [vmem:[#allocation6 + $0x370] sm:$0xff]  ;;  %3043 = vmatprep.subr.bf16.mxu1 %v3621_v9 }
 0x4d9   :  { %v2749_v13 = vadd.f32 %v2743_v4, %v2726_v12  ;;  %v2751_v16 = vmax.f32 %v2747_v8, 0.0  ;;  %v2981_v12 = vld [vmem:[#allocation6 + $0x400] sm:$0xff] }
 0x4da   :  { %v2752_v15 = vmax.f32 %v2748_v11, 0.0 }
 0x4db   :  { %v2753_v17 = vmax.f32 %v2749_v13, 0.0  ;;  %v2964_v13 = vld [vmem:[#allocation6 + $0x2f0] sm:$0xff]  ;;  %3044 = vmatpush1.bf16.msra.mxu1 %v2981_v12 }
 0x4dc   :  { %v2754_v18 = vpack.c.bf16 %v2752_v15, %v2750_v14  ;;  %3398 = vmatprep.subr.bf16.mxu1 %v3620_v3 }
 0x4dd   :  { %v2755_v19 = vpack.c.bf16 %v2753_v17, %v2751_v16 }
 0x4df   :  { %3335 = vmatprep.mubr.msk.bf16.mxu0 %vm2776_vm12, %v2755_v19  ;;  %vm2928_vm12 = vcmp.lt.s32.totalorder %v2110_v21, 144 }
 0x4e0   :  { %2813 = vmatmul.mubr.bf16.vlgmr.msra.gmra.mrb[8].mxu0 %v2754_v18  ;;  %vm2929_vm2 = vmand %vm4648_vm11, %vm2928_vm12 }
 0x4e1   :  { %3341 = vmatpush3.bf16.msra.mxu0 %v2957_v34 }
 0x4e2   :  { %3342 = vmatprep.subr.bf16.mxu0 %v2966_v35 }
 0x4e5   :  { %3343 = vmatpush3.bf16.msra.mxu0 %v2958_v37  ;;  %v2943_v37 = vsub.s32 2, %v4547_v22  ;;  %v3070_v22 = vld [vmem:[#allocation6 + $0x420] sm:$0xff] }
 0x4e6   :  { %3344 = vmatprep.subr.bf16.mxu0 %v2967_v38 }
 0x4e9   :  { %3345 = vmatpush3.bf16.msra.mxu0 %v2959_v40 }
 0x4ea   :  { %3346 = vmatprep.subr.bf16.mxu0 %v2968_v53  ;;  %v3127_v53 = vld [vmem:[#allocation6 + $0x490] sm:$0xff] }
 0x4ed   :  { %3347 = vmatpush3.bf16.msra.mxu0 %v2960_v54  ;;  %v3128_v54 = vld [vmem:[#allocation6 + $0x4a0] sm:$0xff] }
 0x4ee   :  { %3348 = vmatprep.subr.bf16.mxu0 %v2969_v31 }
 0x4f1   :  { %3349 = vmatpush3.bf16.msra.mxu0 %v2961_v32 }
 0x4f2   :  { %3350 = vmatprep.subr.bf16.mxu0 %v2970_v62 }
 0x4f5   :  { %3351 = vmatpush3.bf16.msra.mxu0 %v2962_v63 }
 0x4f6   :  { %3352 = vmatprep.subr.bf16.mxu0 %v2971_v2 }
 0x4f9   :  { %3353 = vmatpush3.bf16.msra.mxu0 %v2963_v6  ;;  %v3138_v6 = vsel %vm1493_vm3, %v3132_v5, 0  ;;  %vm3180_vm3 = vcmask 73728  }
 0x4fa   :  { %3354 = vmatprep.subr.bf16.mxu0 %v2972_v10 }
 0x4fd   :  { %3355 = vmatpush3.bf16.msra.mxu0 %v2964_v13 }
 0x4fe   :  { %3378 = vmatprep.subr.bf16.mxu0 %v3620_v3 }
 0x5b3   :  { %v2814_v20 = vpop.f32.mrb[8].mxu0 }
 0x5b4   :  { %2827 = vrot.lane.b32.xlu0 %v2814_v20, %s3623_s22  ;;  %v2816_v24 = vpop.f32.mrb[9].mxu0 }
 0x5b5   :  { %v2818_v26 = vpop.f32.mrb[10].mxu0 }
 0x5b6   :  { %2831 = vrot.lane.b32.xlu1 %v2818_v26, %s3623_s22  ;;  %v2820_v27 = vpop.f32.mrb[11].mxu0 }
 0x5b8   :  { %2829 = vrot.lane.b32.xlu0 %v2816_v24, %s3623_s22 }
 0x5ba   :  { %2833 = vrot.lane.b32.xlu1 %v2820_v27, %s3623_s22 }
 0x626   :  { %v2828_v42 = vpop.permute.xlu0 %2827 }
 0x628   :  { %v2832_v43 = vpop.permute.xlu1 %2831 }
 0x62a   :  { %v2830_v44 = vpop.permute.xlu0 %2829 }
 0x62b   :  { %v2836_v45 = vsel %vm2835_vm13, %v2828_v42, %v2830_v44 }
 0x62c   :  { %v2840_v46 = vmax.f32 %v2814_v20, %v2836_v45  ;;  %v2834_v47 = vpop.permute.xlu1 %2833 }
 0x62d   :  { %v2837_v48 = vsel %vm2835_vm13, %v2832_v43, %v2834_v47  ;;  %vm2899_vm13 = vcmask 916480   ;;  %v3069_v47 = vld [vmem:[#allocation6 + $0x410] sm:$0xff] }
 0x62e   :  { %2843 = vst.msk [vmem:[#allocation4] sm:$0xff] %vm2842_vm14, %v2840_v46  ;;  %v2841_v49 = vmax.f32 %v2818_v26, %v2837_v48  ;;  %v3073_v48 = vld [vmem:[#allocation6 + $0x450] sm:$0xff] }
 0x630   :  { %2845 = vst.msk [vmem:[#allocation4 + $0x8] sm:$0x3] %vm2844_vm15, %v2841_v49  ;;  %vm2924_vm15 = vcmask 523264   ;;  %v3074_v49 = vld [vmem:[#allocation6 + $0x460] sm:$0xff] }
 0x637   :  { %v2846_v57 = vld [vmem:[#allocation4] ss:$2 sm:$0x1f]  ;;  %v2848_v58 = vld [vmem:[#allocation4 + $0x1] ss:$2 sm:$0x1f] }
 0x638   :  { %v2849_v59 = vmax.f32 %v2846_v57, %v2848_v58 }
 0x63a   :  { %v2862_v60 = vrot.slane %v2849_v59, %v2861_v56  ;;  %v2906_v61 = vcombine.high %v2849_v59, %v2849_v59  ;;  %2854 = vst.msk [vmem:[#allocation5] sm:$0x1] %vm2852_vm1, %v2849_v59  ;;  %vm2893_vm1 = vmand %vm4627_vm6, %vm4632_vm7  ;;  %v2982_v59 = vld [vmem:[%s4706_s1 + $0x2] ss:$0 sm:$0xff] }
 0x63c   :  { %v2863_v0 = vcombine.high %v2862_v60, %v2862_v60  ;;  %v2913_v4 = vrot.slane %v2906_v61, %v2861_v56  ;;  %v2870_v8 = vrot.slane %v2862_v60, %v2861_v56 }
 0x63e   :  { %v2877_v28 = vrot.slane %v2863_v0, %v2861_v56  ;;  %v2920_v11 = vrot.slane %v2913_v4, %v2861_v56  ;;  %v2887_v14 = vcombine.high %v2870_v8, %v2870_v8  ;;  %v3130_v56 = vld [vmem:[#allocation6 + $0x4c0] sm:$0xff]  ;;  %v3131_v4 = vld [vmem:[#allocation6 + $0x4d0] sm:$0xff] }
 0x640   :  { %2878 = vrot.lane.b32.xlu0 %v2877_v28, %s3625_s0  ;;  %v2895_v7 = vcombine.high %v2877_v28, %v2877_v28 }
 0x642   :  { %2896 = vrot.lane.b32.xlu1 %v2895_v7, %s3626_s23  ;;  %v3077_v7 = vld [vmem:[%s4706_s1 + $0x3] ss:$0 sm:$0xff] }
 0x644   :  { %2921 = vrot.lane.b32.xlu0 %v2920_v11, %s3627_s24 }
 0x646   :  { %2888 = vrot.lane.b32.xlu1 %v2887_v14, %s3628_s25 }
 0x6b2   :  { %v2879_v15 = vpop.permute.xlu0 %2878 }
 0x6b3   :  { %v2880_v16 = vrot.slane %v2879_v15, 7 }
 0x6b4   :  { %v2897_v18 = vpop.permute.xlu1 %2896 }
 0x6b5   :  { %v2881_v24 = vsel %vm2842_vm14, %v2880_v16, %v2879_v15  ;;  %v2898_v26 = vrot.slane %v2897_v18, 7  ;;  %vm2904_vm14 = vmand %vm4637_vm9, %vm4642_vm10 }
 0x6b6   :  { %2886 = vst.msk [vmem:[#allocation5] sm:$0x3] %vm2885_vm5, %v2881_v24  ;;  %v2922_v29 = vpop.permute.xlu0 %2921  ;;  %vm3629_vm5 = vmmov 0  }
 0x6b7   :  { %v2923_v30 = vrot.slane %v2922_v29, 7  ;;  %v2900_v21 = vsel %vm2899_vm13, %v2898_v26, %v2897_v18 }
 0x6b8   :  { %v2889_v34 = vpop.permute.xlu1 %2888 }
 0x6b9   :  { %v2925_v35 = vsel %vm2924_vm15, %v2923_v30, %v2922_v29  ;;  %2894 = vst.msk [vmem:[#allocation5 + $0x1] sm:$0x1] %vm2893_vm1, %v2889_v34 }
 0x6ba   :  { %2905 = vst.msk [vmem:[#allocation5 + $0x1] sm:$0x3] %vm2904_vm14, %v2900_v21 }
 0x6bb   :  { %2930 = vst.msk [vmem:[#allocation5 + $0x2] sm:$0x3] %vm2929_vm2, %v2925_v35 }
 0x6c2   :  { %v2931_v38 = vld [vmem:[#allocation5] sm:$0xf] }
 0x6c3   :  { %v2940_v39 = vrot.slane %v2931_v38, %v4556_v25  ;;  %v2948_v40 = vrot.slane %v2931_v38, %v2947_v36  ;;  %v2936_v41 = vrot.slane %v2931_v38, %v4550_v23  ;;  %v2944_v42 = vrot.slane %v2931_v38, %v2943_v37  ;;  %v3071_v25 = vld [vmem:[#allocation6 + $0x430] sm:$0xff]  ;;  %v3072_v23 = vld [vmem:[#allocation6 + $0x440] sm:$0xff] }
 0x6c5   :  { %v2954_v43 = vpack.c.bf16 %v2940_v39, %v2940_v39  ;;  %v2956_v44 = vpack.c.bf16 %v2948_v40, %v2948_v40  ;;  %v2953_v45 = vpack.c.bf16 %v2936_v41, %v2936_v41  ;;  %v2955_v46 = vpack.c.bf16 %v2944_v42, %v2944_v42 }
 0x6c7   :  { %3019 = vmatprep.mubr.bf16.mxu0 %v2954_v43  ;;  %3336 = vmatprep.mubr.msk.bf16.mxu1 %vm2983_vm4, %v2956_v44 }
 0x6c8   :  { %3020 = vmatmul.mubr.bf16.vlgmr.msra.gmra.mrb[12].mxu0 %v2953_v45  ;;  %3060 = vmatmul.mubr.bf16.vlgmr.msra.gmra.mrb[12].mxu1 %v2955_v46 }
 0x6c9   :  { %3379 = vmatpush3.bf16.msra.mxu0 %v3069_v47  ;;  %3394 = vmatprep.mubr.msk.bf16.mxu0 %vm3629_vm5, %v3620_v3 }
 0x6ca   :  { %3380 = vmatprep.subr.bf16.mxu0 %v3620_v3  ;;  %3410 = vmatprep.mubr.msk.bf16.mxu1 %vm3629_vm5, %v3620_v3 }
 0x6cb   :  { %3399 = vmatpush3.bf16.msra.mxu1 %v3127_v53 }
 0x6cc   :  { %3400 = vmatprep.subr.bf16.mxu1 %v3620_v3 }
 0x6cd   :  { %3381 = vmatpush3.bf16.msra.mxu0 %v3070_v22 }
 0x6ce   :  { %3382 = vmatprep.subr.bf16.mxu0 %v3620_v3 }
 0x6cf   :  { %3401 = vmatpush3.bf16.msra.mxu1 %v3128_v54 }
 0x6d0   :  { %3402 = vmatprep.subr.bf16.mxu1 %v3620_v3 }
 0x6d1   :  { %3383 = vmatpush3.bf16.msra.mxu0 %v3071_v25 }
 0x6d2   :  { %3384 = vmatprep.subr.bf16.mxu0 %v3620_v3 }
 0x6d3   :  { %3403 = vmatpush3.bf16.msra.mxu1 %v3129_v55 }
 0x6d4   :  { %3404 = vmatprep.subr.bf16.mxu1 %v3620_v3 }
 0x6d5   :  { %3385 = vmatpush3.bf16.msra.mxu0 %v3072_v23 }
 0x6d6   :  { %3386 = vmatprep.subr.bf16.mxu0 %v3620_v3 }
 0x6d7   :  { %3405 = vmatpush3.bf16.msra.mxu1 %v3130_v56 }
 0x6d8   :  { %3406 = vmatprep.subr.bf16.mxu1 %v3620_v3 }
 0x6d9   :  { %3387 = vmatpush3.bf16.msra.mxu0 %v3073_v48 }
 0x6da   :  { %3388 = vmatprep.subr.bf16.mxu0 %v3620_v3 }
 0x6db   :  { %3407 = vmatpush3.bf16.msra.mxu1 %v3131_v4 }
 0x6dc   :  { %3408 = vmatprep.subr.bf16.mxu1 %v3620_v3 }
 0x6dd   :  { %3389 = vmatpush3.bf16.msra.mxu0 %v3074_v49 }
 0x6de   :  { %3390 = vmatprep.subr.bf16.mxu0 %v3620_v3 }
 0x6df   :  { %3409 = vmatpush3.bf16.msra.mxu1 %v3138_v6 }
 0x6e1   :  { %3391 = vmatpush3.bf16.msra.mxu0 %v3075_v50 }
 0x6e2   :  { %3392 = vmatprep.subr.bf16.mxu0 %v3620_v3  ;;  %v3133_v3 = vld [vmem:[%s4706_s1 + $0x4] ss:$0 sm:$0xff] }
 0x6e5   :  { %3393 = vmatpush3.bf16.msra.mxu0 %v3083_v52 }
 0x79b   :  { %v3356_v57 = vpop.f32.mrb[12].mxu0  ;;  %v3061_v58 = vpop.f32.mrb[12].mxu1 }
 0x79c   :  { %v3357_v31 = vpop.f32.mrb[13].mxu0  ;;  %v3063_v32 = vpop.f32.mrb[13].mxu1 }
 0x79d   :  { %v3358_v33 = vadd.f32 %v3357_v31, %v3356_v57  ;;  %v3359_v60 = vpop.f32.mrb[14].mxu0  ;;  %v3064_v61 = vpop.f32.mrb[14].mxu1 }
 0x79e   :  { %v3360_v62 = vpop.f32.mrb[15].mxu0  ;;  %v3065_v63 = vpop.f32.mrb[15].mxu1 }
 0x79f   :  { %v3022_v0 = vadd.f32 %v3358_v33, %v2982_v59 }
 0x7a1   :  { %v3062_v1 = vadd.f32 %v3061_v58, %v3022_v0 }
 0x7a3   :  { %v3067_v2 = vmax.f32 %v3062_v1, 0.0 }
 0x7a5   :  { %v3068_v28 = vpack.c.bf16 %v3067_v2, %v3067_v2 }
 0x7a7   :  { %3395 = vmatmul.mubr.msk.bf16.vlgmr.msra.gmra.mrb[16].mxu0 %vm3078_vm8, %v3068_v28 }
 0x87a   :  { %v3119_v8 = vpop.f32.mrb[16].mxu0 }
 0x87b   :  { %v3120_v10 = vadd.f32 %v3119_v8, %v3077_v7  ;;  %v3396_v11 = vpop.f32.mrb[17].mxu0 }
 0x87c   :  { %v3122_v12 = vpop.f32.mrb[18].mxu0 }
 0x87d   :  { %v3125_v13 = vmax.f32 %v3120_v10, 0.0  ;;  %v3397_v14 = vpop.f32.mrb[19].mxu0 }
 0x87f   :  { %v3126_v15 = vpack.c.bf16 %v3125_v13, %v3125_v13 }
 0x881   :  { %3411 = vmatmul.mubr.msk.bf16.vlgmr.msra.gmra.mrb[16].mxu1 %vm1329_vm0, %v3126_v15 }
 0x954   :  { %v3174_v16 = vpop.f32.mrb[16].mxu1 }
 0x955   :  { %v3175_v9 = vadd.f32 %v3174_v16, %v3133_v3  ;;  %v3412_v17 = vpop.f32.mrb[17].mxu1 }
 0x956   :  { %v3177_v18 = vpop.f32.mrb[18].mxu1 }
 0x957   :  { %v3413_v19 = vpop.f32.mrb[19].mxu1  ;;  %3181 = vst.msk [vmem:[#allocation8] sm:$0x1] %vm3180_vm3, %v3175_v9 }
 0x958   :  { %3603 = shalt.err (!%p3600_p4)
}
 0x959   :  { %s3604_s10 = scalar_lea.hbm %s4709_s4, 16 }
 0x95a   :  { %p3605_p5 = scmp.ne.s32.totalorder %s4709_s4, %s3604_s10  ;;  %p3608_p6 = scmp.lt.u32.totalorder %s3604_s10, %s4709_s4 }
 0x95c   :  { %p3610_p7 = pnand %p3608_p6, %p3605_p5 }
 0x95e   :  { %3613 = shalt.err (!%p3610_p7)
}
 0x95f   :  { %3191 = dma.vmem_to_hbm [thread:$0]  %s3189_s6, 16, %s4709_s4, [#allocation9]  }
 0x960   :  { %3616 = dma.done.wait [#allocation9], 16  }
 0x961   :  { %3617 = vsyncadd [#allocation9], 4294967280 }
 0x962   :  { %3195 = vsyncpa [#allocation9], 1 }
 0x963   :  { %3196 = vsyncmov [#allocation7] }
 0x966   :  { %s3197_s17 = vpop.sfrf %3196 }
 0x967   :  { %p3339_p8 = scmp.ne.s32.totalorder %s3197_s17, 0 }
 0x969   :  { %3201 = shalt.err (%p3339_p8)  }

</bundles_post_ra>
